<compile_context>
chip_gen: v5e
topology: v5e:2x2
jax: 0.10.0
libtpu: 0.0.40
codegen_flags: <defaults>
</compile_context>

<pallas_src>
import numpy as np
import jax
import jax.numpy as jnp
from jax.experimental import pallas as pl
from jax.experimental.pallas import tpu as pltpu


def _fused_convt1x1_stride_hardswish_kernel(x_ref, w_ref, b_ref, er_ref,
                                            ec_ref, bgm_ref, o_ref):
    # x_ref  : (N, Cin, H, W)    VMEM   input, NCHW
    # w_ref  : (Cin, Cout)       SMEM   ConvTranspose2d 1x1 weights (scalars)
    # b_ref  : (Cout,)           SMEM   bias
    # er_ref : (Ho, H)           VMEM   row expansion: er[3h, h] = 1, else 0
    # ec_ref : (W, Wo)           VMEM   col expansion: ec[w, 3w] = 1, else 0
    # bgm_ref: (Ho, Wo)          VMEM   1.0 where off the stride grid, else 0.0
    # o_ref  : (N, Cout, Ho, Wo) VMEM   final output
    N, Cin, H, W = x_ref.shape
    Cout = o_ref.shape[1]
    sixth = 1.0 / 6.0

    er = er_ref[...]          # (Ho, H)
    ec = ec_ref[...]          # (W, Wo)
    bgm = bgm_ref[...]        # (Ho, Wo)

    for n in range(N):        # N == 1 here; static unroll
        xs = [x_ref[n, k] for k in range(Cin)]          # hoisted (H, W) loads
        for c in range(Cout):                           # static unroll, 8 chans
            # 1x1 transposed-conv contraction: SMEM-scalar splat FMAs (VPU).
            acc = w_ref[0, c] * xs[0]
            for k in range(1, Cin):
                acc = acc + w_ref[k, c] * xs[k]
            bc = b_ref[c]
            v1 = acc + bc                                # (H, W)

            # hardswish chain on the dense (on-grid) values
            hs = v1 * jnp.clip(v1 + 3.0, 0.0, 6.0) * sixth

            # stride-3 scatter into the (Ho, Wo) plane via exact 0/1 expansion
            # matmuls on the MXU: zeros everywhere off the stride grid.
            full = jnp.dot(
                jnp.dot(er, hs, preferred_element_type=jnp.float32),
                ec, preferred_element_type=jnp.float32)  # (Ho, Wo)

            # off-grid positions see v1 = bias only -> same hardswish chain on
            # a per-channel scalar constant (scalar-core math).
            bg = bc * jnp.clip(bc + 3.0, 0.0, 6.0) * sixth

            o_ref[n, c] = full + bgm * bg


def convt_stride1x1_hardswish(x, weight, bias, *, stride=3, output_padding=1):
    """x: (N, Cin, H, W) NCHW; weight: (Cin, Cout, 1, 1) (PyTorch
    ConvTranspose2d layout); bias: (Cout,).  Returns (N, Cout, Ho, Wo)."""
    N, Cin, H, W = x.shape
    Cout = weight.shape[1]
    Ho = (H - 1) * stride + 1 + output_padding
    Wo = (W - 1) * stride + 1 + output_padding

    # Host-built constant operands (numpy -> constants under jit, no XLA ops).
    er = np.zeros((Ho, H), np.float32)
    er[np.arange(H) * stride, np.arange(H)] = 1.0
    ec = np.zeros((W, Wo), np.float32)
    ec[np.arange(W), np.arange(W) * stride] = 1.0
    ii = np.arange(Ho)[:, None]
    jj = np.arange(Wo)[None, :]
    bgm = ((ii % stride != 0) | (jj % stride != 0)).astype(np.float32)

    w2 = weight.reshape(Cin, Cout)   # (Cin, Cout, 1, 1) -> (Cin, Cout) bitcast

    # Whole working set (< 1 MiB incl. lane padding) fits in VMEM on
    # v5e/v6e/v7x: single block, no grid, no pipelining, single TensorCore.
    out = pl.pallas_call(
        _fused_convt1x1_stride_hardswish_kernel,
        out_shape=jax.ShapeDtypeStruct((N, Cout, Ho, Wo), jnp.float32),
        in_specs=[
            pl.BlockSpec(memory_space=pltpu.MemorySpace.VMEM),   # x
            pl.BlockSpec(memory_space=pltpu.MemorySpace.SMEM),   # weight
            pl.BlockSpec(memory_space=pltpu.MemorySpace.SMEM),   # bias
            pl.BlockSpec(memory_space=pltpu.MemorySpace.VMEM),   # er
            pl.BlockSpec(memory_space=pltpu.MemorySpace.VMEM),   # ec
            pl.BlockSpec(memory_space=pltpu.MemorySpace.VMEM),   # bgm
        ],
        out_specs=pl.BlockSpec(memory_space=pltpu.MemorySpace.VMEM),
    )(x, w2, bias, jnp.asarray(er), jnp.asarray(ec), jnp.asarray(bgm))
    return out


if __name__ == "__main__":
    key = jax.random.PRNGKey(0)
    kx, kw, kb = jax.random.split(key, 3)

    # Matches the module's x2 = torch.randn(1, 5, 32, 32)
    x2 = jax.random.normal(kx, (1, 5, 32, 32), dtype=jnp.float32)

    # ConvTranspose2d(5, 8, 1, stride=3, output_padding=1) parameters.
    cin, cout = 5, 8
    bound = 1.0 / (cin ** 0.5)
    weight = jax.random.uniform(kw, (cin, cout, 1, 1),
                                minval=-bound, maxval=bound, dtype=jnp.float32)
    bias = jax.random.uniform(kb, (cout,),
                              minval=-bound, maxval=bound, dtype=jnp.float32)

    fn = jax.jit(convt_stride1x1_hardswish)
    out = jax.block_until_ready(fn(x2, weight, bias))

    assert out.shape == (1, 8, 95, 95), out.shape
    assert bool(jnp.all(jnp.isfinite(out)))

    # Pure-JAX reference of the same decomposition (validates the kernel).
    w2 = weight.reshape(cin, cout)
    v1 = (w2[:, :, None, None] * x2[0][:, None, :, :]).sum(0) \
        + bias[:, None, None]                                   # (cout, 32, 32)
    dense = v1 * jnp.clip(v1 + 3.0, 0.0, 6.0) / 6.0
    bg = bias * jnp.clip(bias + 3.0, 0.0, 6.0) / 6.0
    ref = jnp.broadcast_to(bg[None, :, None, None], (1, cout, 95, 95))
    ref = ref.at[:, :, ::3, ::3].set(dense[None])
    assert bool(jnp.allclose(out, ref, atol=1e-4, rtol=1e-4)), \
        float(jnp.max(jnp.abs(out - ref)))

    print("KERNEL_OK")
</pallas_src>

<mosaic_0001>
module attributes {stable_mosaic.version = 11 : i64} {
  func.func @_fused_convt1x1_stride_hardswish_kernel(%arg0: memref<1x5x32x32xf32, #tpu.memory_space<vmem>>, %arg1: memref<5x8xf32, #tpu.memory_space<smem>>, %arg2: memref<8xf32, #tpu.memory_space<smem>>, %arg3: memref<95x32xf32, #tpu.memory_space<vmem>>, %arg4: memref<32x95xf32, #tpu.memory_space<vmem>>, %arg5: memref<95x95xf32, #tpu.memory_space<vmem>>, %arg6: memref<1x8x95x95xf32, #tpu.memory_space<vmem>>) attributes {dimension_semantics = [], scalar_prefetch = 0 : i64, scratch_operands = 0 : i64, tpu.core_type = #tpu.core_type<tc>} {
    %c0 = arith.constant 0 : index
    %c0_0 = arith.constant 0 : index
    %0 = vector.load %arg3[%c0, %c0_0] : memref<95x32xf32, #tpu.memory_space<vmem>>, vector<95x32xf32>
    %c0_1 = arith.constant 0 : index
    %c0_2 = arith.constant 0 : index
    %1 = vector.load %arg4[%c0_1, %c0_2] : memref<32x95xf32, #tpu.memory_space<vmem>>, vector<32x95xf32>
    %c0_3 = arith.constant 0 : index
    %c0_4 = arith.constant 0 : index
    %2 = vector.load %arg5[%c0_3, %c0_4] : memref<95x95xf32, #tpu.memory_space<vmem>>, vector<95x95xf32>
    %c0_5 = arith.constant 0 : index
    %c0_6 = arith.constant 0 : index
    %c0_7 = arith.constant 0 : index
    %c0_8 = arith.constant 0 : index
    %3 = vector.load %arg0[%c0_5, %c0_6, %c0_7, %c0_8] : memref<1x5x32x32xf32, #tpu.memory_space<vmem>>, vector<1x1x32x32xf32>
    %4 = vector.shape_cast %3 : vector<1x1x32x32xf32> to vector<32x32xf32>
    %c0_9 = arith.constant 0 : index
    %c1 = arith.constant 1 : index
    %c0_10 = arith.constant 0 : index
    %c0_11 = arith.constant 0 : index
    %5 = vector.load %arg0[%c0_9, %c1, %c0_10, %c0_11] : memref<1x5x32x32xf32, #tpu.memory_space<vmem>>, vector<1x1x32x32xf32>
    %6 = vector.shape_cast %5 : vector<1x1x32x32xf32> to vector<32x32xf32>
    %c0_12 = arith.constant 0 : index
    %c2 = arith.constant 2 : index
    %c0_13 = arith.constant 0 : index
    %c0_14 = arith.constant 0 : index
    %7 = vector.load %arg0[%c0_12, %c2, %c0_13, %c0_14] : memref<1x5x32x32xf32, #tpu.memory_space<vmem>>, vector<1x1x32x32xf32>
    %8 = vector.shape_cast %7 : vector<1x1x32x32xf32> to vector<32x32xf32>
    %c0_15 = arith.constant 0 : index
    %c3 = arith.constant 3 : index
    %c0_16 = arith.constant 0 : index
    %c0_17 = arith.constant 0 : index
    %9 = vector.load %arg0[%c0_15, %c3, %c0_16, %c0_17] : memref<1x5x32x32xf32, #tpu.memory_space<vmem>>, vector<1x1x32x32xf32>
    %10 = vector.shape_cast %9 : vector<1x1x32x32xf32> to vector<32x32xf32>
    %c0_18 = arith.constant 0 : index
    %c4 = arith.constant 4 : index
    %c0_19 = arith.constant 0 : index
    %c0_20 = arith.constant 0 : index
    %11 = vector.load %arg0[%c0_18, %c4, %c0_19, %c0_20] : memref<1x5x32x32xf32, #tpu.memory_space<vmem>>, vector<1x1x32x32xf32>
    %12 = vector.shape_cast %11 : vector<1x1x32x32xf32> to vector<32x32xf32>
    %c0_21 = arith.constant 0 : index
    %c0_22 = arith.constant 0 : index
    %13 = memref.load %arg1[%c0_21, %c0_22] : memref<5x8xf32, #tpu.memory_space<smem>>
    %14 = vector.broadcast %13 : f32 to vector<32x32xf32>
    %15 = arith.mulf %14, %4 : vector<32x32xf32>
    %c1_23 = arith.constant 1 : index
    %c0_24 = arith.constant 0 : index
    %16 = memref.load %arg1[%c1_23, %c0_24] : memref<5x8xf32, #tpu.memory_space<smem>>
    %17 = vector.broadcast %16 : f32 to vector<32x32xf32>
    %18 = arith.mulf %17, %6 : vector<32x32xf32>
    %19 = arith.addf %15, %18 : vector<32x32xf32>
    %c2_25 = arith.constant 2 : index
    %c0_26 = arith.constant 0 : index
    %20 = memref.load %arg1[%c2_25, %c0_26] : memref<5x8xf32, #tpu.memory_space<smem>>
    %21 = vector.broadcast %20 : f32 to vector<32x32xf32>
    %22 = arith.mulf %21, %8 : vector<32x32xf32>
    %23 = arith.addf %19, %22 : vector<32x32xf32>
    %c3_27 = arith.constant 3 : index
    %c0_28 = arith.constant 0 : index
    %24 = memref.load %arg1[%c3_27, %c0_28] : memref<5x8xf32, #tpu.memory_space<smem>>
    %25 = vector.broadcast %24 : f32 to vector<32x32xf32>
    %26 = arith.mulf %25, %10 : vector<32x32xf32>
    %27 = arith.addf %23, %26 : vector<32x32xf32>
    %c4_29 = arith.constant 4 : index
    %c0_30 = arith.constant 0 : index
    %28 = memref.load %arg1[%c4_29, %c0_30] : memref<5x8xf32, #tpu.memory_space<smem>>
    %29 = vector.broadcast %28 : f32 to vector<32x32xf32>
    %30 = arith.mulf %29, %12 : vector<32x32xf32>
    %31 = arith.addf %27, %30 : vector<32x32xf32>
    %c0_31 = arith.constant 0 : index
    %32 = memref.load %arg2[%c0_31] : memref<8xf32, #tpu.memory_space<smem>>
    %33 = vector.broadcast %32 : f32 to vector<32x32xf32>
    %34 = arith.addf %31, %33 : vector<32x32xf32>
    %cst = arith.constant 3.000000e+00 : f32
    %35 = vector.broadcast %cst : f32 to vector<32x32xf32>
    %36 = arith.addf %34, %35 : vector<32x32xf32>
    %cst_32 = arith.constant 0.000000e+00 : f32
    %cst_33 = arith.constant 6.000000e+00 : f32
    %37 = vector.broadcast %cst_32 : f32 to vector<32x32xf32>
    %38 = arith.maximumf %37, %36 : vector<32x32xf32>
    %39 = vector.broadcast %cst_33 : f32 to vector<32x32xf32>
    %40 = arith.minimumf %39, %38 : vector<32x32xf32>
    %41 = arith.mulf %34, %40 : vector<32x32xf32>
    %cst_34 = arith.constant 0.166666672 : f32
    %42 = vector.broadcast %cst_34 : f32 to vector<32x32xf32>
    %43 = arith.mulf %41, %42 : vector<32x32xf32>
    %cst_35 = arith.constant dense<0.000000e+00> : vector<95x32xf32>
    %44 = tpu.matmul %0, %43, %cst_35 {dimension_numbers = #tpu.dot_dimension_numbers<[1], [0], [0], [1], [0, 0, 1, 1], [], []>} : vector<95x32xf32>, vector<32x32xf32>, vector<95x32xf32> -> vector<95x32xf32>
    %cst_36 = arith.constant dense<0.000000e+00> : vector<95x95xf32>
    %45 = tpu.matmul %44, %1, %cst_36 {dimension_numbers = #tpu.dot_dimension_numbers<[1], [0], [0], [1], [0, 0, 1, 1], [], []>} : vector<95x32xf32>, vector<32x95xf32>, vector<95x95xf32> -> vector<95x95xf32>
    %cst_37 = arith.constant 3.000000e+00 : f32
    %46 = arith.addf %32, %cst_37 : f32
    %cst_38 = arith.constant 0.000000e+00 : f32
    %cst_39 = arith.constant 6.000000e+00 : f32
    %47 = arith.maximumf %cst_38, %46 : f32
    %48 = arith.minimumf %cst_39, %47 : f32
    %49 = arith.mulf %32, %48 : f32
    %cst_40 = arith.constant 0.166666672 : f32
    %50 = arith.mulf %49, %cst_40 : f32
    %51 = vector.broadcast %50 : f32 to vector<95x95xf32>
    %52 = arith.mulf %2, %51 : vector<95x95xf32>
    %53 = arith.addf %45, %52 : vector<95x95xf32>
    %c0_41 = arith.constant 0 : index
    %c0_42 = arith.constant 0 : index
    %c0_43 = arith.constant 0 : index
    %c0_44 = arith.constant 0 : index
    %54 = vector.load %arg6[%c0_41, %c0_42, %c0_43, %c0_44] : memref<1x8x95x95xf32, #tpu.memory_space<vmem>>, vector<1x1x95x95xf32>
    %55 = vector.shape_cast %54 : vector<1x1x95x95xf32> to vector<95x95xf32>
    %56 = vector.shape_cast %53 : vector<95x95xf32> to vector<1x1x95x95xf32>
    tpu.vector_store %arg6[%c0_41, %c0_42, %c0_43, %c0_44], %56 {strides = array<i32>} : memref<1x8x95x95xf32, #tpu.memory_space<vmem>>, vector<1x1x95x95xf32>,
    %c0_45 = arith.constant 0 : index
    %c1_46 = arith.constant 1 : index
    %57 = memref.load %arg1[%c0_45, %c1_46] : memref<5x8xf32, #tpu.memory_space<smem>>
    %58 = vector.broadcast %57 : f32 to vector<32x32xf32>
    %59 = arith.mulf %58, %4 : vector<32x32xf32>
    %c1_47 = arith.constant 1 : index
    %c1_48 = arith.constant 1 : index
    %60 = memref.load %arg1[%c1_47, %c1_48] : memref<5x8xf32, #tpu.memory_space<smem>>
    %61 = vector.broadcast %60 : f32 to vector<32x32xf32>
    %62 = arith.mulf %61, %6 : vector<32x32xf32>
    %63 = arith.addf %59, %62 : vector<32x32xf32>
    %c2_49 = arith.constant 2 : index
    %c1_50 = arith.constant 1 : index
    %64 = memref.load %arg1[%c2_49, %c1_50] : memref<5x8xf32, #tpu.memory_space<smem>>
    %65 = vector.broadcast %64 : f32 to vector<32x32xf32>
    %66 = arith.mulf %65, %8 : vector<32x32xf32>
    %67 = arith.addf %63, %66 : vector<32x32xf32>
    %c3_51 = arith.constant 3 : index
    %c1_52 = arith.constant 1 : index
    %68 = memref.load %arg1[%c3_51, %c1_52] : memref<5x8xf32, #tpu.memory_space<smem>>
    %69 = vector.broadcast %68 : f32 to vector<32x32xf32>
    %70 = arith.mulf %69, %10 : vector<32x32xf32>
    %71 = arith.addf %67, %70 : vector<32x32xf32>
    %c4_53 = arith.constant 4 : index
    %c1_54 = arith.constant 1 : index
    %72 = memref.load %arg1[%c4_53, %c1_54] : memref<5x8xf32, #tpu.memory_space<smem>>
    %73 = vector.broadcast %72 : f32 to vector<32x32xf32>
    %74 = arith.mulf %73, %12 : vector<32x32xf32>
    %75 = arith.addf %71, %74 : vector<32x32xf32>
    %c1_55 = arith.constant 1 : index
    %76 = memref.load %arg2[%c1_55] : memref<8xf32, #tpu.memory_space<smem>>
    %77 = vector.broadcast %76 : f32 to vector<32x32xf32>
    %78 = arith.addf %75, %77 : vector<32x32xf32>
    %cst_56 = arith.constant 3.000000e+00 : f32
    %79 = vector.broadcast %cst_56 : f32 to vector<32x32xf32>
    %80 = arith.addf %78, %79 : vector<32x32xf32>
    %cst_57 = arith.constant 0.000000e+00 : f32
    %cst_58 = arith.constant 6.000000e+00 : f32
    %81 = vector.broadcast %cst_57 : f32 to vector<32x32xf32>
    %82 = arith.maximumf %81, %80 : vector<32x32xf32>
    %83 = vector.broadcast %cst_58 : f32 to vector<32x32xf32>
    %84 = arith.minimumf %83, %82 : vector<32x32xf32>
    %85 = arith.mulf %78, %84 : vector<32x32xf32>
    %cst_59 = arith.constant 0.166666672 : f32
    %86 = vector.broadcast %cst_59 : f32 to vector<32x32xf32>
    %87 = arith.mulf %85, %86 : vector<32x32xf32>
    %cst_60 = arith.constant dense<0.000000e+00> : vector<95x32xf32>
    %88 = tpu.matmul %0, %87, %cst_60 {dimension_numbers = #tpu.dot_dimension_numbers<[1], [0], [0], [1], [0, 0, 1, 1], [], []>} : vector<95x32xf32>, vector<32x32xf32>, vector<95x32xf32> -> vector<95x32xf32>
    %cst_61 = arith.constant dense<0.000000e+00> : vector<95x95xf32>
    %89 = tpu.matmul %88, %1, %cst_61 {dimension_numbers = #tpu.dot_dimension_numbers<[1], [0], [0], [1], [0, 0, 1, 1], [], []>} : vector<95x32xf32>, vector<32x95xf32>, vector<95x95xf32> -> vector<95x95xf32>
    %cst_62 = arith.constant 3.000000e+00 : f32
    %90 = arith.addf %76, %cst_62 : f32
    %cst_63 = arith.constant 0.000000e+00 : f32
    %cst_64 = arith.constant 6.000000e+00 : f32
    %91 = arith.maximumf %cst_63, %90 : f32
    %92 = arith.minimumf %cst_64, %91 : f32
    %93 = arith.mulf %76, %92 : f32
    %cst_65 = arith.constant 0.166666672 : f32
    %94 = arith.mulf %93, %cst_65 : f32
    %95 = vector.broadcast %94 : f32 to vector<95x95xf32>
    %96 = arith.mulf %2, %95 : vector<95x95xf32>
    %97 = arith.addf %89, %96 : vector<95x95xf32>
    %c0_66 = arith.constant 0 : index
    %c1_67 = arith.constant 1 : index
    %c0_68 = arith.constant 0 : index
    %c0_69 = arith.constant 0 : index
    %98 = vector.load %arg6[%c0_66, %c1_67, %c0_68, %c0_69] : memref<1x8x95x95xf32, #tpu.memory_space<vmem>>, vector<1x1x95x95xf32>
    %99 = vector.shape_cast %98 : vector<1x1x95x95xf32> to vector<95x95xf32>
    %100 = vector.shape_cast %97 : vector<95x95xf32> to vector<1x1x95x95xf32>
    tpu.vector_store %arg6[%c0_66, %c1_67, %c0_68, %c0_69], %100 {strides = array<i32>} : memref<1x8x95x95xf32, #tpu.memory_space<vmem>>, vector<1x1x95x95xf32>,
    %c0_70 = arith.constant 0 : index
    %c2_71 = arith.constant 2 : index
    %101 = memref.load %arg1[%c0_70, %c2_71] : memref<5x8xf32, #tpu.memory_space<smem>>
    %102 = vector.broadcast %101 : f32 to vector<32x32xf32>
    %103 = arith.mulf %102, %4 : vector<32x32xf32>
    %c1_72 = arith.constant 1 : index
    %c2_73 = arith.constant 2 : index
    %104 = memref.load %arg1[%c1_72, %c2_73] : memref<5x8xf32, #tpu.memory_space<smem>>
    %105 = vector.broadcast %104 : f32 to vector<32x32xf32>
    %106 = arith.mulf %105, %6 : vector<32x32xf32>
    %107 = arith.addf %103, %106 : vector<32x32xf32>
    %c2_74 = arith.constant 2 : index
    %c2_75 = arith.constant 2 : index
    %108 = memref.load %arg1[%c2_74, %c2_75] : memref<5x8xf32, #tpu.memory_space<smem>>
    %109 = vector.broadcast %108 : f32 to vector<32x32xf32>
    %110 = arith.mulf %109, %8 : vector<32x32xf32>
    %111 = arith.addf %107, %110 : vector<32x32xf32>
    %c3_76 = arith.constant 3 : index
    %c2_77 = arith.constant 2 : index
    %112 = memref.load %arg1[%c3_76, %c2_77] : memref<5x8xf32, #tpu.memory_space<smem>>
    %113 = vector.broadcast %112 : f32 to vector<32x32xf32>
    %114 = arith.mulf %113, %10 : vector<32x32xf32>
    %115 = arith.addf %111, %114 : vector<32x32xf32>
    %c4_78 = arith.constant 4 : index
    %c2_79 = arith.constant 2 : index
    %116 = memref.load %arg1[%c4_78, %c2_79] : memref<5x8xf32, #tpu.memory_space<smem>>
    %117 = vector.broadcast %116 : f32 to vector<32x32xf32>
    %118 = arith.mulf %117, %12 : vector<32x32xf32>
    %119 = arith.addf %115, %118 : vector<32x32xf32>
    %c2_80 = arith.constant 2 : index
    %120 = memref.load %arg2[%c2_80] : memref<8xf32, #tpu.memory_space<smem>>
    %121 = vector.broadcast %120 : f32 to vector<32x32xf32>
    %122 = arith.addf %119, %121 : vector<32x32xf32>
    %cst_81 = arith.constant 3.000000e+00 : f32
    %123 = vector.broadcast %cst_81 : f32 to vector<32x32xf32>
    %124 = arith.addf %122, %123 : vector<32x32xf32>
    %cst_82 = arith.constant 0.000000e+00 : f32
    %cst_83 = arith.constant 6.000000e+00 : f32
    %125 = vector.broadcast %cst_82 : f32 to vector<32x32xf32>
    %126 = arith.maximumf %125, %124 : vector<32x32xf32>
    %127 = vector.broadcast %cst_83 : f32 to vector<32x32xf32>
    %128 = arith.minimumf %127, %126 : vector<32x32xf32>
    %129 = arith.mulf %122, %128 : vector<32x32xf32>
    %cst_84 = arith.constant 0.166666672 : f32
    %130 = vector.broadcast %cst_84 : f32 to vector<32x32xf32>
    %131 = arith.mulf %129, %130 : vector<32x32xf32>
    %cst_85 = arith.constant dense<0.000000e+00> : vector<95x32xf32>
    %132 = tpu.matmul %0, %131, %cst_85 {dimension_numbers = #tpu.dot_dimension_numbers<[1], [0], [0], [1], [0, 0, 1, 1], [], []>} : vector<95x32xf32>, vector<32x32xf32>, vector<95x32xf32> -> vector<95x32xf32>
    %cst_86 = arith.constant dense<0.000000e+00> : vector<95x95xf32>
    %133 = tpu.matmul %132, %1, %cst_86 {dimension_numbers = #tpu.dot_dimension_numbers<[1], [0], [0], [1], [0, 0, 1, 1], [], []>} : vector<95x32xf32>, vector<32x95xf32>, vector<95x95xf32> -> vector<95x95xf32>
    %cst_87 = arith.constant 3.000000e+00 : f32
    %134 = arith.addf %120, %cst_87 : f32
    %cst_88 = arith.constant 0.000000e+00 : f32
    %cst_89 = arith.constant 6.000000e+00 : f32
    %135 = arith.maximumf %cst_88, %134 : f32
    %136 = arith.minimumf %cst_89, %135 : f32
    %137 = arith.mulf %120, %136 : f32
    %cst_90 = arith.constant 0.166666672 : f32
    %138 = arith.mulf %137, %cst_90 : f32
    %139 = vector.broadcast %138 : f32 to vector<95x95xf32>
    %140 = arith.mulf %2, %139 : vector<95x95xf32>
    %141 = arith.addf %133, %140 : vector<95x95xf32>
    %c0_91 = arith.constant 0 : index
    %c2_92 = arith.constant 2 : index
    %c0_93 = arith.constant 0 : index
    %c0_94 = arith.constant 0 : index
    %142 = vector.load %arg6[%c0_91, %c2_92, %c0_93, %c0_94] : memref<1x8x95x95xf32, #tpu.memory_space<vmem>>, vector<1x1x95x95xf32>
    %143 = vector.shape_cast %142 : vector<1x1x95x95xf32> to vector<95x95xf32>
    %144 = vector.shape_cast %141 : vector<95x95xf32> to vector<1x1x95x95xf32>
    tpu.vector_store %arg6[%c0_91, %c2_92, %c0_93, %c0_94], %144 {strides = array<i32>} : memref<1x8x95x95xf32, #tpu.memory_space<vmem>>, vector<1x1x95x95xf32>,
    %c0_95 = arith.constant 0 : index
    %c3_96 = arith.constant 3 : index
    %145 = memref.load %arg1[%c0_95, %c3_96] : memref<5x8xf32, #tpu.memory_space<smem>>
    %146 = vector.broadcast %145 : f32 to vector<32x32xf32>
    %147 = arith.mulf %146, %4 : vector<32x32xf32>
    %c1_97 = arith.constant 1 : index
    %c3_98 = arith.constant 3 : index
    %148 = memref.load %arg1[%c1_97, %c3_98] : memref<5x8xf32, #tpu.memory_space<smem>>
    %149 = vector.broadcast %148 : f32 to vector<32x32xf32>
    %150 = arith.mulf %149, %6 : vector<32x32xf32>
    %151 = arith.addf %147, %150 : vector<32x32xf32>
    %c2_99 = arith.constant 2 : index
    %c3_100 = arith.constant 3 : index
    %152 = memref.load %arg1[%c2_99, %c3_100] : memref<5x8xf32, #tpu.memory_space<smem>>
    %153 = vector.broadcast %152 : f32 to vector<32x32xf32>
    %154 = arith.mulf %153, %8 : vector<32x32xf32>
    %155 = arith.addf %151, %154 : vector<32x32xf32>
    %c3_101 = arith.constant 3 : index
    %c3_102 = arith.constant 3 : index
    %156 = memref.load %arg1[%c3_101, %c3_102] : memref<5x8xf32, #tpu.memory_space<smem>>
    %157 = vector.broadcast %156 : f32 to vector<32x32xf32>
    %158 = arith.mulf %157, %10 : vector<32x32xf32>
    %159 = arith.addf %155, %158 : vector<32x32xf32>
    %c4_103 = arith.constant 4 : index
    %c3_104 = arith.constant 3 : index
    %160 = memref.load %arg1[%c4_103, %c3_104] : memref<5x8xf32, #tpu.memory_space<smem>>
    %161 = vector.broadcast %160 : f32 to vector<32x32xf32>
    %162 = arith.mulf %161, %12 : vector<32x32xf32>
    %163 = arith.addf %159, %162 : vector<32x32xf32>
    %c3_105 = arith.constant 3 : index
    %164 = memref.load %arg2[%c3_105] : memref<8xf32, #tpu.memory_space<smem>>
    %165 = vector.broadcast %164 : f32 to vector<32x32xf32>
    %166 = arith.addf %163, %165 : vector<32x32xf32>
    %cst_106 = arith.constant 3.000000e+00 : f32
    %167 = vector.broadcast %cst_106 : f32 to vector<32x32xf32>
    %168 = arith.addf %166, %167 : vector<32x32xf32>
    %cst_107 = arith.constant 0.000000e+00 : f32
    %cst_108 = arith.constant 6.000000e+00 : f32
    %169 = vector.broadcast %cst_107 : f32 to vector<32x32xf32>
    %170 = arith.maximumf %169, %168 : vector<32x32xf32>
    %171 = vector.broadcast %cst_108 : f32 to vector<32x32xf32>
    %172 = arith.minimumf %171, %170 : vector<32x32xf32>
    %173 = arith.mulf %166, %172 : vector<32x32xf32>
    %cst_109 = arith.constant 0.166666672 : f32
    %174 = vector.broadcast %cst_109 : f32 to vector<32x32xf32>
    %175 = arith.mulf %173, %174 : vector<32x32xf32>
    %cst_110 = arith.constant dense<0.000000e+00> : vector<95x32xf32>
    %176 = tpu.matmul %0, %175, %cst_110 {dimension_numbers = #tpu.dot_dimension_numbers<[1], [0], [0], [1], [0, 0, 1, 1], [], []>} : vector<95x32xf32>, vector<32x32xf32>, vector<95x32xf32> -> vector<95x32xf32>
    %cst_111 = arith.constant dense<0.000000e+00> : vector<95x95xf32>
    %177 = tpu.matmul %176, %1, %cst_111 {dimension_numbers = #tpu.dot_dimension_numbers<[1], [0], [0], [1], [0, 0, 1, 1], [], []>} : vector<95x32xf32>, vector<32x95xf32>, vector<95x95xf32> -> vector<95x95xf32>
    %cst_112 = arith.constant 3.000000e+00 : f32
    %178 = arith.addf %164, %cst_112 : f32
    %cst_113 = arith.constant 0.000000e+00 : f32
    %cst_114 = arith.constant 6.000000e+00 : f32
    %179 = arith.maximumf %cst_113, %178 : f32
    %180 = arith.minimumf %cst_114, %179 : f32
    %181 = arith.mulf %164, %180 : f32
    %cst_115 = arith.constant 0.166666672 : f32
    %182 = arith.mulf %181, %cst_115 : f32
    %183 = vector.broadcast %182 : f32 to vector<95x95xf32>
    %184 = arith.mulf %2, %183 : vector<95x95xf32>
    %185 = arith.addf %177, %184 : vector<95x95xf32>
    %c0_116 = arith.constant 0 : index
    %c3_117 = arith.constant 3 : index
    %c0_118 = arith.constant 0 : index
    %c0_119 = arith.constant 0 : index
    %186 = vector.load %arg6[%c0_116, %c3_117, %c0_118, %c0_119] : memref<1x8x95x95xf32, #tpu.memory_space<vmem>>, vector<1x1x95x95xf32>
    %187 = vector.shape_cast %186 : vector<1x1x95x95xf32> to vector<95x95xf32>
    %188 = vector.shape_cast %185 : vector<95x95xf32> to vector<1x1x95x95xf32>
    tpu.vector_store %arg6[%c0_116, %c3_117, %c0_118, %c0_119], %188 {strides = array<i32>} : memref<1x8x95x95xf32, #tpu.memory_space<vmem>>, vector<1x1x95x95xf32>,
    %c0_120 = arith.constant 0 : index
    %c4_121 = arith.constant 4 : index
    %189 = memref.load %arg1[%c0_120, %c4_121] : memref<5x8xf32, #tpu.memory_space<smem>>
    %190 = vector.broadcast %189 : f32 to vector<32x32xf32>
    %191 = arith.mulf %190, %4 : vector<32x32xf32>
    %c1_122 = arith.constant 1 : index
    %c4_123 = arith.constant 4 : index
    %192 = memref.load %arg1[%c1_122, %c4_123] : memref<5x8xf32, #tpu.memory_space<smem>>
    %193 = vector.broadcast %192 : f32 to vector<32x32xf32>
    %194 = arith.mulf %193, %6 : vector<32x32xf32>
    %195 = arith.addf %191, %194 : vector<32x32xf32>
    %c2_124 = arith.constant 2 : index
    %c4_125 = arith.constant 4 : index
    %196 = memref.load %arg1[%c2_124, %c4_125] : memref<5x8xf32, #tpu.memory_space<smem>>
    %197 = vector.broadcast %196 : f32 to vector<32x32xf32>
    %198 = arith.mulf %197, %8 : vector<32x32xf32>
    %199 = arith.addf %195, %198 : vector<32x32xf32>
    %c3_126 = arith.constant 3 : index
    %c4_127 = arith.constant 4 : index
    %200 = memref.load %arg1[%c3_126, %c4_127] : memref<5x8xf32, #tpu.memory_space<smem>>
    %201 = vector.broadcast %200 : f32 to vector<32x32xf32>
    %202 = arith.mulf %201, %10 : vector<32x32xf32>
    %203 = arith.addf %199, %202 : vector<32x32xf32>
    %c4_128 = arith.constant 4 : index
    %c4_129 = arith.constant 4 : index
    %204 = memref.load %arg1[%c4_128, %c4_129] : memref<5x8xf32, #tpu.memory_space<smem>>
    %205 = vector.broadcast %204 : f32 to vector<32x32xf32>
    %206 = arith.mulf %205, %12 : vector<32x32xf32>
    %207 = arith.addf %203, %206 : vector<32x32xf32>
    %c4_130 = arith.constant 4 : index
    %208 = memref.load %arg2[%c4_130] : memref<8xf32, #tpu.memory_space<smem>>
    %209 = vector.broadcast %208 : f32 to vector<32x32xf32>
    %210 = arith.addf %207, %209 : vector<32x32xf32>
    %cst_131 = arith.constant 3.000000e+00 : f32
    %211 = vector.broadcast %cst_131 : f32 to vector<32x32xf32>
    %212 = arith.addf %210, %211 : vector<32x32xf32>
    %cst_132 = arith.constant 0.000000e+00 : f32
    %cst_133 = arith.constant 6.000000e+00 : f32
    %213 = vector.broadcast %cst_132 : f32 to vector<32x32xf32>
    %214 = arith.maximumf %213, %212 : vector<32x32xf32>
    %215 = vector.broadcast %cst_133 : f32 to vector<32x32xf32>
    %216 = arith.minimumf %215, %214 : vector<32x32xf32>
    %217 = arith.mulf %210, %216 : vector<32x32xf32>
    %cst_134 = arith.constant 0.166666672 : f32
    %218 = vector.broadcast %cst_134 : f32 to vector<32x32xf32>
    %219 = arith.mulf %217, %218 : vector<32x32xf32>
    %cst_135 = arith.constant dense<0.000000e+00> : vector<95x32xf32>
    %220 = tpu.matmul %0, %219, %cst_135 {dimension_numbers = #tpu.dot_dimension_numbers<[1], [0], [0], [1], [0, 0, 1, 1], [], []>} : vector<95x32xf32>, vector<32x32xf32>, vector<95x32xf32> -> vector<95x32xf32>
    %cst_136 = arith.constant dense<0.000000e+00> : vector<95x95xf32>
    %221 = tpu.matmul %220, %1, %cst_136 {dimension_numbers = #tpu.dot_dimension_numbers<[1], [0], [0], [1], [0, 0, 1, 1], [], []>} : vector<95x32xf32>, vector<32x95xf32>, vector<95x95xf32> -> vector<95x95xf32>
    %cst_137 = arith.constant 3.000000e+00 : f32
    %222 = arith.addf %208, %cst_137 : f32
    %cst_138 = arith.constant 0.000000e+00 : f32
    %cst_139 = arith.constant 6.000000e+00 : f32
    %223 = arith.maximumf %cst_138, %222 : f32
    %224 = arith.minimumf %cst_139, %223 : f32
    %225 = arith.mulf %208, %224 : f32
    %cst_140 = arith.constant 0.166666672 : f32
    %226 = arith.mulf %225, %cst_140 : f32
    %227 = vector.broadcast %226 : f32 to vector<95x95xf32>
    %228 = arith.mulf %2, %227 : vector<95x95xf32>
    %229 = arith.addf %221, %228 : vector<95x95xf32>
    %c0_141 = arith.constant 0 : index
    %c4_142 = arith.constant 4 : index
    %c0_143 = arith.constant 0 : index
    %c0_144 = arith.constant 0 : index
    %230 = vector.load %arg6[%c0_141, %c4_142, %c0_143, %c0_144] : memref<1x8x95x95xf32, #tpu.memory_space<vmem>>, vector<1x1x95x95xf32>
    %231 = vector.shape_cast %230 : vector<1x1x95x95xf32> to vector<95x95xf32>
    %232 = vector.shape_cast %229 : vector<95x95xf32> to vector<1x1x95x95xf32>
    tpu.vector_store %arg6[%c0_141, %c4_142, %c0_143, %c0_144], %232 {strides = array<i32>} : memref<1x8x95x95xf32, #tpu.memory_space<vmem>>, vector<1x1x95x95xf32>,
    %c0_145 = arith.constant 0 : index
    %c5 = arith.constant 5 : index
    %233 = memref.load %arg1[%c0_145, %c5] : memref<5x8xf32, #tpu.memory_space<smem>>
    %234 = vector.broadcast %233 : f32 to vector<32x32xf32>
    %235 = arith.mulf %234, %4 : vector<32x32xf32>
    %c1_146 = arith.constant 1 : index
    %c5_147 = arith.constant 5 : index
    %236 = memref.load %arg1[%c1_146, %c5_147] : memref<5x8xf32, #tpu.memory_space<smem>>
    %237 = vector.broadcast %236 : f32 to vector<32x32xf32>
    %238 = arith.mulf %237, %6 : vector<32x32xf32>
    %239 = arith.addf %235, %238 : vector<32x32xf32>
    %c2_148 = arith.constant 2 : index
    %c5_149 = arith.constant 5 : index
    %240 = memref.load %arg1[%c2_148, %c5_149] : memref<5x8xf32, #tpu.memory_space<smem>>
    %241 = vector.broadcast %240 : f32 to vector<32x32xf32>
    %242 = arith.mulf %241, %8 : vector<32x32xf32>
    %243 = arith.addf %239, %242 : vector<32x32xf32>
    %c3_150 = arith.constant 3 : index
    %c5_151 = arith.constant 5 : index
    %244 = memref.load %arg1[%c3_150, %c5_151] : memref<5x8xf32, #tpu.memory_space<smem>>
    %245 = vector.broadcast %244 : f32 to vector<32x32xf32>
    %246 = arith.mulf %245, %10 : vector<32x32xf32>
    %247 = arith.addf %243, %246 : vector<32x32xf32>
    %c4_152 = arith.constant 4 : index
    %c5_153 = arith.constant 5 : index
    %248 = memref.load %arg1[%c4_152, %c5_153] : memref<5x8xf32, #tpu.memory_space<smem>>
    %249 = vector.broadcast %248 : f32 to vector<32x32xf32>
    %250 = arith.mulf %249, %12 : vector<32x32xf32>
    %251 = arith.addf %247, %250 : vector<32x32xf32>
    %c5_154 = arith.constant 5 : index
    %252 = memref.load %arg2[%c5_154] : memref<8xf32, #tpu.memory_space<smem>>
    %253 = vector.broadcast %252 : f32 to vector<32x32xf32>
    %254 = arith.addf %251, %253 : vector<32x32xf32>
    %cst_155 = arith.constant 3.000000e+00 : f32
    %255 = vector.broadcast %cst_155 : f32 to vector<32x32xf32>
    %256 = arith.addf %254, %255 : vector<32x32xf32>
    %cst_156 = arith.constant 0.000000e+00 : f32
    %cst_157 = arith.constant 6.000000e+00 : f32
    %257 = vector.broadcast %cst_156 : f32 to vector<32x32xf32>
    %258 = arith.maximumf %257, %256 : vector<32x32xf32>
    %259 = vector.broadcast %cst_157 : f32 to vector<32x32xf32>
    %260 = arith.minimumf %259, %258 : vector<32x32xf32>
    %261 = arith.mulf %254, %260 : vector<32x32xf32>
    %cst_158 = arith.constant 0.166666672 : f32
    %262 = vector.broadcast %cst_158 : f32 to vector<32x32xf32>
    %263 = arith.mulf %261, %262 : vector<32x32xf32>
    %cst_159 = arith.constant dense<0.000000e+00> : vector<95x32xf32>
    %264 = tpu.matmul %0, %263, %cst_159 {dimension_numbers = #tpu.dot_dimension_numbers<[1], [0], [0], [1], [0, 0, 1, 1], [], []>} : vector<95x32xf32>, vector<32x32xf32>, vector<95x32xf32> -> vector<95x32xf32>
    %cst_160 = arith.constant dense<0.000000e+00> : vector<95x95xf32>
    %265 = tpu.matmul %264, %1, %cst_160 {dimension_numbers = #tpu.dot_dimension_numbers<[1], [0], [0], [1], [0, 0, 1, 1], [], []>} : vector<95x32xf32>, vector<32x95xf32>, vector<95x95xf32> -> vector<95x95xf32>
    %cst_161 = arith.constant 3.000000e+00 : f32
    %266 = arith.addf %252, %cst_161 : f32
    %cst_162 = arith.constant 0.000000e+00 : f32
    %cst_163 = arith.constant 6.000000e+00 : f32
    %267 = arith.maximumf %cst_162, %266 : f32
    %268 = arith.minimumf %cst_163, %267 : f32
    %269 = arith.mulf %252, %268 : f32
    %cst_164 = arith.constant 0.166666672 : f32
    %270 = arith.mulf %269, %cst_164 : f32
    %271 = vector.broadcast %270 : f32 to vector<95x95xf32>
    %272 = arith.mulf %2, %271 : vector<95x95xf32>
    %273 = arith.addf %265, %272 : vector<95x95xf32>
    %c0_165 = arith.constant 0 : index
    %c5_166 = arith.constant 5 : index
    %c0_167 = arith.constant 0 : index
    %c0_168 = arith.constant 0 : index
    %274 = vector.load %arg6[%c0_165, %c5_166, %c0_167, %c0_168] : memref<1x8x95x95xf32, #tpu.memory_space<vmem>>, vector<1x1x95x95xf32>
    %275 = vector.shape_cast %274 : vector<1x1x95x95xf32> to vector<95x95xf32>
    %276 = vector.shape_cast %273 : vector<95x95xf32> to vector<1x1x95x95xf32>
    tpu.vector_store %arg6[%c0_165, %c5_166, %c0_167, %c0_168], %276 {strides = array<i32>} : memref<1x8x95x95xf32, #tpu.memory_space<vmem>>, vector<1x1x95x95xf32>,
    %c0_169 = arith.constant 0 : index
    %c6 = arith.constant 6 : index
    %277 = memref.load %arg1[%c0_169, %c6] : memref<5x8xf32, #tpu.memory_space<smem>>
    %278 = vector.broadcast %277 : f32 to vector<32x32xf32>
    %279 = arith.mulf %278, %4 : vector<32x32xf32>
    %c1_170 = arith.constant 1 : index
    %c6_171 = arith.constant 6 : index
    %280 = memref.load %arg1[%c1_170, %c6_171] : memref<5x8xf32, #tpu.memory_space<smem>>
    %281 = vector.broadcast %280 : f32 to vector<32x32xf32>
    %282 = arith.mulf %281, %6 : vector<32x32xf32>
    %283 = arith.addf %279, %282 : vector<32x32xf32>
    %c2_172 = arith.constant 2 : index
    %c6_173 = arith.constant 6 : index
    %284 = memref.load %arg1[%c2_172, %c6_173] : memref<5x8xf32, #tpu.memory_space<smem>>
    %285 = vector.broadcast %284 : f32 to vector<32x32xf32>
    %286 = arith.mulf %285, %8 : vector<32x32xf32>
    %287 = arith.addf %283, %286 : vector<32x32xf32>
    %c3_174 = arith.constant 3 : index
    %c6_175 = arith.constant 6 : index
    %288 = memref.load %arg1[%c3_174, %c6_175] : memref<5x8xf32, #tpu.memory_space<smem>>
    %289 = vector.broadcast %288 : f32 to vector<32x32xf32>
    %290 = arith.mulf %289, %10 : vector<32x32xf32>
    %291 = arith.addf %287, %290 : vector<32x32xf32>
    %c4_176 = arith.constant 4 : index
    %c6_177 = arith.constant 6 : index
    %292 = memref.load %arg1[%c4_176, %c6_177] : memref<5x8xf32, #tpu.memory_space<smem>>
    %293 = vector.broadcast %292 : f32 to vector<32x32xf32>
    %294 = arith.mulf %293, %12 : vector<32x32xf32>
    %295 = arith.addf %291, %294 : vector<32x32xf32>
    %c6_178 = arith.constant 6 : index
    %296 = memref.load %arg2[%c6_178] : memref<8xf32, #tpu.memory_space<smem>>
    %297 = vector.broadcast %296 : f32 to vector<32x32xf32>
    %298 = arith.addf %295, %297 : vector<32x32xf32>
    %cst_179 = arith.constant 3.000000e+00 : f32
    %299 = vector.broadcast %cst_179 : f32 to vector<32x32xf32>
    %300 = arith.addf %298, %299 : vector<32x32xf32>
    %cst_180 = arith.constant 0.000000e+00 : f32
    %cst_181 = arith.constant 6.000000e+00 : f32
    %301 = vector.broadcast %cst_180 : f32 to vector<32x32xf32>
    %302 = arith.maximumf %301, %300 : vector<32x32xf32>
    %303 = vector.broadcast %cst_181 : f32 to vector<32x32xf32>
    %304 = arith.minimumf %303, %302 : vector<32x32xf32>
    %305 = arith.mulf %298, %304 : vector<32x32xf32>
    %cst_182 = arith.constant 0.166666672 : f32
    %306 = vector.broadcast %cst_182 : f32 to vector<32x32xf32>
    %307 = arith.mulf %305, %306 : vector<32x32xf32>
    %cst_183 = arith.constant dense<0.000000e+00> : vector<95x32xf32>
    %308 = tpu.matmul %0, %307, %cst_183 {dimension_numbers = #tpu.dot_dimension_numbers<[1], [0], [0], [1], [0, 0, 1, 1], [], []>} : vector<95x32xf32>, vector<32x32xf32>, vector<95x32xf32> -> vector<95x32xf32>
    %cst_184 = arith.constant dense<0.000000e+00> : vector<95x95xf32>
    %309 = tpu.matmul %308, %1, %cst_184 {dimension_numbers = #tpu.dot_dimension_numbers<[1], [0], [0], [1], [0, 0, 1, 1], [], []>} : vector<95x32xf32>, vector<32x95xf32>, vector<95x95xf32> -> vector<95x95xf32>
    %cst_185 = arith.constant 3.000000e+00 : f32
    %310 = arith.addf %296, %cst_185 : f32
    %cst_186 = arith.constant 0.000000e+00 : f32
    %cst_187 = arith.constant 6.000000e+00 : f32
    %311 = arith.maximumf %cst_186, %310 : f32
    %312 = arith.minimumf %cst_187, %311 : f32
    %313 = arith.mulf %296, %312 : f32
    %cst_188 = arith.constant 0.166666672 : f32
    %314 = arith.mulf %313, %cst_188 : f32
    %315 = vector.broadcast %314 : f32 to vector<95x95xf32>
    %316 = arith.mulf %2, %315 : vector<95x95xf32>
    %317 = arith.addf %309, %316 : vector<95x95xf32>
    %c0_189 = arith.constant 0 : index
    %c6_190 = arith.constant 6 : index
    %c0_191 = arith.constant 0 : index
    %c0_192 = arith.constant 0 : index
    %318 = vector.load %arg6[%c0_189, %c6_190, %c0_191, %c0_192] : memref<1x8x95x95xf32, #tpu.memory_space<vmem>>, vector<1x1x95x95xf32>
    %319 = vector.shape_cast %318 : vector<1x1x95x95xf32> to vector<95x95xf32>
    %320 = vector.shape_cast %317 : vector<95x95xf32> to vector<1x1x95x95xf32>
    tpu.vector_store %arg6[%c0_189, %c6_190, %c0_191, %c0_192], %320 {strides = array<i32>} : memref<1x8x95x95xf32, #tpu.memory_space<vmem>>, vector<1x1x95x95xf32>,
    %c0_193 = arith.constant 0 : index
    %c7 = arith.constant 7 : index
    %321 = memref.load %arg1[%c0_193, %c7] : memref<5x8xf32, #tpu.memory_space<smem>>
    %322 = vector.broadcast %321 : f32 to vector<32x32xf32>
    %323 = arith.mulf %322, %4 : vector<32x32xf32>
    %c1_194 = arith.constant 1 : index
    %c7_195 = arith.constant 7 : index
    %324 = memref.load %arg1[%c1_194, %c7_195] : memref<5x8xf32, #tpu.memory_space<smem>>
    %325 = vector.broadcast %324 : f32 to vector<32x32xf32>
    %326 = arith.mulf %325, %6 : vector<32x32xf32>
    %327 = arith.addf %323, %326 : vector<32x32xf32>
    %c2_196 = arith.constant 2 : index
    %c7_197 = arith.constant 7 : index
    %328 = memref.load %arg1[%c2_196, %c7_197] : memref<5x8xf32, #tpu.memory_space<smem>>
    %329 = vector.broadcast %328 : f32 to vector<32x32xf32>
    %330 = arith.mulf %329, %8 : vector<32x32xf32>
    %331 = arith.addf %327, %330 : vector<32x32xf32>
    %c3_198 = arith.constant 3 : index
    %c7_199 = arith.constant 7 : index
    %332 = memref.load %arg1[%c3_198, %c7_199] : memref<5x8xf32, #tpu.memory_space<smem>>
    %333 = vector.broadcast %332 : f32 to vector<32x32xf32>
    %334 = arith.mulf %333, %10 : vector<32x32xf32>
    %335 = arith.addf %331, %334 : vector<32x32xf32>
    %c4_200 = arith.constant 4 : index
    %c7_201 = arith.constant 7 : index
    %336 = memref.load %arg1[%c4_200, %c7_201] : memref<5x8xf32, #tpu.memory_space<smem>>
    %337 = vector.broadcast %336 : f32 to vector<32x32xf32>
    %338 = arith.mulf %337, %12 : vector<32x32xf32>
    %339 = arith.addf %335, %338 : vector<32x32xf32>
    %c7_202 = arith.constant 7 : index
    %340 = memref.load %arg2[%c7_202] : memref<8xf32, #tpu.memory_space<smem>>
    %341 = vector.broadcast %340 : f32 to vector<32x32xf32>
    %342 = arith.addf %339, %341 : vector<32x32xf32>
    %cst_203 = arith.constant 3.000000e+00 : f32
    %343 = vector.broadcast %cst_203 : f32 to vector<32x32xf32>
    %344 = arith.addf %342, %343 : vector<32x32xf32>
    %cst_204 = arith.constant 0.000000e+00 : f32
    %cst_205 = arith.constant 6.000000e+00 : f32
    %345 = vector.broadcast %cst_204 : f32 to vector<32x32xf32>
    %346 = arith.maximumf %345, %344 : vector<32x32xf32>
    %347 = vector.broadcast %cst_205 : f32 to vector<32x32xf32>
    %348 = arith.minimumf %347, %346 : vector<32x32xf32>
    %349 = arith.mulf %342, %348 : vector<32x32xf32>
    %cst_206 = arith.constant 0.166666672 : f32
    %350 = vector.broadcast %cst_206 : f32 to vector<32x32xf32>
    %351 = arith.mulf %349, %350 : vector<32x32xf32>
    %cst_207 = arith.constant dense<0.000000e+00> : vector<95x32xf32>
    %352 = tpu.matmul %0, %351, %cst_207 {dimension_numbers = #tpu.dot_dimension_numbers<[1], [0], [0], [1], [0, 0, 1, 1], [], []>} : vector<95x32xf32>, vector<32x32xf32>, vector<95x32xf32> -> vector<95x32xf32>
    %cst_208 = arith.constant dense<0.000000e+00> : vector<95x95xf32>
    %353 = tpu.matmul %352, %1, %cst_208 {dimension_numbers = #tpu.dot_dimension_numbers<[1], [0], [0], [1], [0, 0, 1, 1], [], []>} : vector<95x32xf32>, vector<32x95xf32>, vector<95x95xf32> -> vector<95x95xf32>
    %cst_209 = arith.constant 3.000000e+00 : f32
    %354 = arith.addf %340, %cst_209 : f32
    %cst_210 = arith.constant 0.000000e+00 : f32
    %cst_211 = arith.constant 6.000000e+00 : f32
    %355 = arith.maximumf %cst_210, %354 : f32
    %356 = arith.minimumf %cst_211, %355 : f32
    %357 = arith.mulf %340, %356 : f32
    %cst_212 = arith.constant 0.166666672 : f32
    %358 = arith.mulf %357, %cst_212 : f32
    %359 = vector.broadcast %358 : f32 to vector<95x95xf32>
    %360 = arith.mulf %2, %359 : vector<95x95xf32>
    %361 = arith.addf %353, %360 : vector<95x95xf32>
    %c0_213 = arith.constant 0 : index
    %c7_214 = arith.constant 7 : index
    %c0_215 = arith.constant 0 : index
    %c0_216 = arith.constant 0 : index
    %362 = vector.load %arg6[%c0_213, %c7_214, %c0_215, %c0_216] : memref<1x8x95x95xf32, #tpu.memory_space<vmem>>, vector<1x1x95x95xf32>
    %363 = vector.shape_cast %362 : vector<1x1x95x95xf32> to vector<95x95xf32>
    %364 = vector.shape_cast %361 : vector<95x95xf32> to vector<1x1x95x95xf32>
    tpu.vector_store %arg6[%c0_213, %c7_214, %c0_215, %c0_216], %364 {strides = array<i32>} : memref<1x8x95x95xf32, #tpu.memory_space<vmem>>, vector<1x1x95x95xf32>,
    return
  }
}

</mosaic_0001>

<bundles_post_ra>
// kernel: convt_stride1x1_hardswish.1
= control target key start
LH: loop header
LB: loop body
LE: loop exit
PB: predicated region body
PF: predicated region fallthrough
CT: control target
= control target key end

     0   :  { %11 = vsyncpa [#allocation3], 0  ;;  %s4188_s0 = inlined_call_operand.hbm [shape: f32[1,5,32,32], index: 0, kind: input, shape index: {}]   ;;  %s4189_s1 = inlined_call_operand.vmem [shape: f32[5,8], index: 1, kind: input, shape index: {}]   ;;  %s4190_s2 = inlined_call_operand.vmem [shape: f32[8], index: 2, kind: input, shape index: {}]   ;;  %s4191_s3 = inlined_call_operand.hbm [shape: f32[95,32], index: 3, kind: input, shape index: {}]   ;;  %s4192_s4 = inlined_call_operand.hbm [shape: f32[32,95], index: 4, kind: input, shape index: {}]   ;;  %s4193_s5 = inlined_call_operand.hbm [shape: f32[95,95], index: 5, kind: input, shape index: {}]   ;;  %s4194_s6 = inlined_call_operand.vmem [shape: f32[1,8,95,95], index: 6, kind: output, shape index: {}]  }
   0x1   :  { %12 = vsyncpa [#allocation4], 0 }
   0x2   :  { %13 = vsyncpa [#allocation7], 0 }
   0x3   :  { %14 = vsyncpa [#allocation9], 0 }
   0x4   :  { %15 = vsyncpa [#allocation12], 0  ;;  %s51_s23 = sshll.u32 %s4191_s3, 4  ;;  %s2666_s24 = smov [#allocation8]   ;;  %s52_s23 = int_to_ptr.hbm [resolvable:$true] %s51_s23 }
   0x5   :  { %s53_s25 = sshll.u32 %s2666_s24, 4  ;;  %s20_s28 = sshll.u32 %s4188_s0, 4  ;;  %s54_s25 = int_to_ptr.vmem [resolvable:$true] %s53_s25  ;;  %s21_s28 = int_to_ptr.hbm [resolvable:$true] %s20_s28 }
   0x6   :  { %s2667_s29 = smov 128   ;;  %s2668_s30 = smov 8  }
   0x7   :  { %59 = dma.hbm_to_vmem [thread:$0]  %s52_s23, 1536, %s54_s25, [#allocation9], %s2667_s29, %s2667_s29, %s2668_s30  }
   0x8   :  { %s2669_s7 = smov [#allocation2]   ;;  %s34_s3 = sshll.u32 %s4189_s1, 4  ;;  %s35_s3 = int_to_ptr.vmem [resolvable:$true] %s34_s3 }
   0x9   :  { %s22_s8 = sshll.u32 %s2669_s7, 4  ;;  %s43_s12 = sshll.u32 %s4190_s2, 4  ;;  %s23_s8 = int_to_ptr.vmem [resolvable:$true] %s22_s8  ;;  %s44_s12 = int_to_ptr.vmem [resolvable:$true] %s43_s12 }
   0xa   :  { %28 = dma.hbm_to_vmem [thread:$0]  %s21_s28, 2560, %s23_s8, [#allocation3], %s2667_s29, %s2667_s29, %s2668_s30  }
   0xb   :  { %s2670_s13 = smov [#allocation5]   ;;  %s2671_s14 = smov [#allocation6]  }
   0xc   :  { %37 = dma.vmem_to_smem %s35_s3, 128, %s2670_s13, [#allocation4]  }
   0xd   :  { %46 = dma.vmem_to_smem %s44_s12, 16, %s2671_s14, [#allocation7]  }
   0xe   :  { %s64_s17 = sshll.u32 %s4192_s4, 4  ;;  %s2672_s1 = smov [#allocation10]   ;;  %s65_s17 = int_to_ptr.hbm [resolvable:$true] %s64_s17 }
   0xf   :  { %s66_s18 = sshll.u32 %s2672_s1, 4  ;;  %s77_s21 = sshll.u32 %s4193_s5, 4  ;;  %s67_s18 = int_to_ptr.vmem [resolvable:$true] %s66_s18  ;;  %s78_s21 = int_to_ptr.hbm [resolvable:$true] %s77_s21 }
  0x10   :  { %72 = dma.hbm_to_vmem [thread:$0]  %s65_s17, 512, %s67_s18, [#allocation9], %s2667_s29, %s2667_s29, %s2668_s30  }
  0x11   :  { %s2673_s2 = smov [#allocation11]  }
  0x12   :  { %s79_s22 = sshll.u32 %s2673_s2, 4  ;;  %s80_s22 = int_to_ptr.vmem [resolvable:$true] %s79_s22 }
  0x13   :  { %85 = dma.hbm_to_vmem [thread:$0]  %s78_s21, 1536, %s80_s22, [#allocation12], %s2667_s29, %s2667_s29, %s2668_s30  }
  0x14   :  { %2656 = dma.done.wait [#allocation3], 2560  }
  0x15   :  { %2657 = vsyncadd [#allocation3], 4294964736 }
  0x16   :  { %2658 = dma.done.wait [#allocation4], 128  }
  0x17   :  { %2659 = vsyncadd [#allocation4], 4294967168 }
  0x18   :  { %2660 = dma.done.wait [#allocation7], 16  }
  0x19   :  { %2661 = vsyncadd [#allocation7], 4294967280 }
  0x1a   :  { %2662 = dma.done.wait [#allocation9], 2048  }
  0x1b   :  { %2663 = vsyncadd [#allocation9], 4294965248 }
  0x1c   :  { %2664 = dma.done.wait [#allocation12], 1536  }
  0x1d   :  { %2665 = vsyncadd [#allocation12], 4294965760 }
  0x1e   :  { %110 = sfence }
  0x1f   :  { %s2198_s4 = sld [smem:[#allocation5 + $0x1]]  ;;  %v2741_v0 = vld [vmem:[#allocation2 + $0x18] sm:$0xff]  ;;  %v2745_v1 = vld [vmem:[#allocation2 + $0x10] sm:$0xff]  ;;  %v2747_v2 = vld [vmem:[#allocation2 + $0x8] sm:$0xff]  ;;  %vm235_vm0 = vcmask 261120   ;;  %vm432_vm1 = vcmask 777216  }
  0x20   :  { %s2199_s5 = sld [smem:[#allocation5 + $0x81]]  ;;  %v2749_v3 = vld [vmem:[#allocation2 + $0x38] sm:$0xff]  ;;  %v2753_v4 = vld [vmem:[#allocation2 + $0x30] sm:$0xff]  ;;  %v2755_v5 = vld [vmem:[#allocation2 + $0x28] sm:$0xff]  ;;  %vm444_vm2 = vcmask 776192  }
  0x21   :  { %s2200_s23 = sld [smem:[#allocation5 + $0x101]]  ;;  %v2757_v6 = vld [vmem:[#allocation2 + $0x58] sm:$0xff]  ;;  %v2759_v8 = vld [vmem:[#allocation2 + $0x50] sm:$0xff]  ;;  %v2761_v9 = vld [vmem:[#allocation2 + $0x48] sm:$0xff] }
  0x22   :  { %s2201_s24 = sld [smem:[#allocation5 + $0x181]]  ;;  %v2765_v10 = vld [vmem:[#allocation2 + $0x78] sm:$0xff]  ;;  %v2775_v18 = vld [vmem:[#allocation2 + $0x70] sm:$0xff]  ;;  %v2785_v25 = vld [vmem:[#allocation2 + $0x68] sm:$0xff] }
  0x23   :  { %s2743_s25 = sld [smem:[#allocation5 + $0x201]]  ;;  %v2772_v15 = vld [vmem:[#allocation2 + $0x98] sm:$0xff]  ;;  %v2777_v19 = vld [vmem:[#allocation2 + $0x90] sm:$0xff]  ;;  %v2787_v26 = vld [vmem:[#allocation2 + $0x88] sm:$0xff] }
  0x24   :  { %s2751_s26 = sld [smem:[#allocation6 + $0x1]]  ;;  %v2794_v32 = vld [vmem:[#allocation2] sm:$0xff] }
  0x25   :  { %v447_v7 = vstv %s2198_s4  ;;  %s2763_s27 = sld [smem:[#allocation5 + $0x3]]  ;;  %v2796_v33 = vld [vmem:[#allocation2 + $0x20] sm:$0xff] }
  0x26   :  { %v451_v11 = vmul.f32 %v447_v7, %v2741_v0  ;;  %v453_v12 = vstv %s2199_s5  ;;  %v450_v13 = vmul.f32 %v447_v7, %v2745_v1  ;;  %v449_v14 = vmul.f32 %v447_v7, %v2747_v2  ;;  %s2770_s28 = sld [smem:[#allocation5 + $0x83]]  ;;  %v2798_v34 = vld [vmem:[#allocation2 + $0x40] sm:$0xff] }
  0x27   :  { %v457_v16 = vmul.f32 %v453_v12, %v2749_v3  ;;  %v463_v17 = vstv %s2200_s23  ;;  %v456_v20 = vmul.f32 %v453_v12, %v2753_v4  ;;  %v455_v21 = vmul.f32 %v453_v12, %v2755_v5  ;;  %s2781_s29 = sld [smem:[#allocation5 + $0x103]]  ;;  %v2804_v39 = vld [vmem:[#allocation2 + $0x60] sm:$0xff] }
  0x28   :  { %v467_v22 = vmul.f32 %v463_v17, %v2757_v6  ;;  %v473_v23 = vstv %s2201_s24  ;;  %v466_v24 = vmul.f32 %v463_v17, %v2759_v8  ;;  %v465_v27 = vmul.f32 %v463_v17, %v2761_v9  ;;  %s2790_s30 = sld [smem:[#allocation5 + $0x183]]  ;;  %v2807_v44 = vld [vmem:[#allocation2 + $0x80] sm:$0xff] }
  0x29   :  { %v461_v28 = vadd.f32 %v457_v16, %v451_v11  ;;  %v477_v29 = vmul.f32 %v473_v23, %v2765_v10  ;;  %v483_v30 = vstv %s2743_s25  ;;  %v460_v31 = vadd.f32 %v456_v20, %v450_v13  ;;  %s2809_s7 = sld [smem:[#allocation5 + $0x203]] }
  0x2a   :  { %v487_v35 = vmul.f32 %v483_v30, %v2772_v15  ;;  %v493_v36 = vstv %s2751_s26  ;;  %v476_v37 = vmul.f32 %v473_v23, %v2775_v18  ;;  %v486_v38 = vmul.f32 %v483_v30, %v2777_v19  ;;  %s2815_s8 = sld [smem:[#allocation6 + $0x3]] }
  0x2b   :  { %v471_v40 = vadd.f32 %v467_v22, %v461_v28  ;;  %v470_v41 = vadd.f32 %v466_v24, %v460_v31  ;;  %v459_v42 = vadd.f32 %v455_v21, %v449_v14  ;;  %v475_v43 = vmul.f32 %v473_v23, %v2785_v25  ;;  %s2818_s9 = sld [smem:[#allocation5]] }
  0x2c   :  { %v485_v45 = vmul.f32 %v483_v30, %v2787_v26  ;;  %v448_v46 = vmul.f32 %v447_v7, %v2794_v32  ;;  %v454_v47 = vmul.f32 %v453_v12, %v2796_v33  ;;  %v464_v48 = vmul.f32 %v463_v17, %v2798_v34  ;;  %s2827_s10 = sld [smem:[#allocation5 + $0x80]] }
  0x2d   :  { %v481_v49 = vadd.f32 %v477_v29, %v471_v40  ;;  %v480_v50 = vadd.f32 %v476_v37, %v470_v41  ;;  %v469_v51 = vadd.f32 %v465_v27, %v459_v42  ;;  %v474_v52 = vmul.f32 %v473_v23, %v2804_v39  ;;  %s2831_s3 = sld [smem:[#allocation5 + $0x100]] }
  0x2e   :  { %v458_v53 = vadd.f32 %v454_v47, %v448_v46  ;;  %v484_v54 = vmul.f32 %v483_v30, %v2807_v44  ;;  %v2822_v55 = vstv %s2763_s27  ;;  %v2825_v56 = vstv %s2770_s28  ;;  %s2841_s0 = sld [smem:[#allocation5 + $0x180]] }
  0x2f   :  { %v491_v57 = vadd.f32 %v487_v35, %v481_v49  ;;  %v490_v58 = vadd.f32 %v486_v38, %v480_v50  ;;  %v479_v59 = vadd.f32 %v475_v43, %v469_v51  ;;  %v941_v60 = vmul.f32 %v2822_v55, %v2741_v0  ;;  %s2855_s11 = sld [smem:[#allocation5 + $0x200]] }
  0x30   :  { %v468_v61 = vadd.f32 %v464_v48, %v458_v53  ;;  %v947_v62 = vmul.f32 %v2825_v56, %v2749_v3  ;;  %v2836_v63 = vstv %s2781_s29  ;;  %v2839_v7 = vstv %s2790_s30  ;;  %s2861_s12 = sld [smem:[#allocation6]] }
  0x31   :  { %v497_v11 = vadd.f32 %v493_v36, %v491_v57  ;;  %v496_v12 = vadd.f32 %v493_v36, %v490_v58  ;;  %v489_v13 = vadd.f32 %v485_v45, %v479_v59  ;;  %v957_v14 = vmul.f32 %v2836_v63, %v2757_v6  ;;  %s2869_s13 = sld [smem:[#allocation5 + $0x2]] }
  0x32   :  { %v478_v16 = vadd.f32 %v474_v52, %v468_v61  ;;  %v951_v17 = vadd.f32 %v947_v62, %v941_v60  ;;  %v967_v20 = vmul.f32 %v2839_v7, %v2765_v10  ;;  %v2848_v24 = vstv %s2809_s7  ;;  %s2873_s14 = sld [smem:[#allocation5 + $0x82]] }
  0x33   :  { %v501_v21 = vadd.f32 3.0, %v497_v11  ;;  %v500_v22 = vadd.f32 3.0, %v496_v12  ;;  %v495_v23 = vadd.f32 %v493_v36, %v489_v13  ;;  %v977_v29 = vmul.f32 %v2848_v24, %v2772_v15  ;;  %s2876_s15 = sld [smem:[#allocation5 + $0x102]] }
  0x34   :  { %v488_v27 = vadd.f32 %v484_v54, %v478_v16  ;;  %v961_v28 = vadd.f32 %v957_v14, %v951_v17  ;;  %v2853_v30 = vstv %s2815_s8  ;;  %v164_v38 = vstv %s2818_s9  ;;  %s2884_s16 = sld [smem:[#allocation5 + $0x182]] }
  0x35   :  { %v505_v31 = vmax.f32 %v501_v21, 0.0  ;;  %v504_v35 = vmax.f32 %v500_v22, 0.0  ;;  %v499_v37 = vadd.f32 3.0, %v495_v23  ;;  %v168_v42 = vmul.f32 %v164_v38, %v2741_v0  ;;  %s2887_s17 = sld [smem:[#allocation5 + $0x202]] }
  0x36   :  { %v494_v40 = vadd.f32 %v493_v36, %v488_v27  ;;  %v971_v41 = vadd.f32 %v967_v20, %v961_v28  ;;  %v170_v43 = vstv %s2827_s10  ;;  %v180_v51 = vstv %s2831_s3  ;;  %s2914_s1 = sld [smem:[#allocation6 + $0x2]] }
  0x37   :  { %v509_v45 = vmin.f32 %v505_v31, 6.0  ;;  %v508_v46 = vmin.f32 %v504_v35, 6.0  ;;  %v503_v47 = vmax.f32 %v499_v37, 0.0  ;;  %v174_v48 = vmul.f32 %v170_v43, %v2749_v3  ;;  %s2366_s18 = sld [smem:[#allocation5 + $0x5]] }
  0x38   :  { %v498_v49 = vadd.f32 3.0, %v494_v40  ;;  %v981_v50 = vadd.f32 %v977_v29, %v971_v41  ;;  %v190_v52 = vstv %s2841_s0  ;;  %v184_v60 = vmul.f32 %v180_v51, %v2757_v6  ;;  %s2367_s19 = sld [smem:[#allocation5 + $0x85]] }
  0x39   :  { %v513_v53 = vmul.f32 %v509_v45, %v497_v11  ;;  %v512_v54 = vmul.f32 %v508_v46, %v496_v12  ;;  %v507_v57 = vmin.f32 %v503_v47, 6.0  ;;  %v178_v59 = vadd.f32 %v174_v48, %v168_v42  ;;  %v2889_v47 = vld [vmem:[#allocation8] sm:$0xff]  ;;  %s2368_s20 = sld [smem:[#allocation5 + $0x105]] }
  0x3a   :  { %v502_v36 = vmax.f32 %v498_v49, 0.0  ;;  %v987_v58 = vadd.f32 %v2853_v30, %v981_v50  ;;  %v194_v14 = vmul.f32 %v190_v52, %v2765_v10  ;;  %v200_v21 = vstv %s2855_s11  ;;  %s2369_s21 = sld [smem:[#allocation5 + $0x185]] }
  0x3b   :  { %v517_v61 = vmul.f32 0.16666667, %v513_v53  ;;  %v516_v62 = vmul.f32 0.16666667, %v512_v54  ;;  %v511_v13 = vmul.f32 %v507_v57, %v495_v23  ;;  %v188_v20 = vadd.f32 %v184_v60, %v178_v59  ;;  %s2370_s2 = sld [smem:[#allocation5 + $0x205]] }
  0x3c   :  { %v506_v16 = vmin.f32 %v502_v36, 6.0  ;;  %v991_v17 = vadd.f32 3.0, %v987_v58  ;;  %v204_v12 = vmul.f32 %v200_v21, %v2772_v15  ;;  %v167_v22 = vmul.f32 %v164_v38, %v2745_v1  ;;  %s3056_s22 = sld [smem:[#allocation6 + $0x5]] }
  0x3d   :  { %530 = vmatpush.msra.mxu2 %v517_v61  ;;  %v515_v11 = vmul.f32 0.16666667, %v511_v13  ;;  %v198_v28 = vadd.f32 %v194_v14, %v188_v20  ;;  %v173_v29 = vmul.f32 %v170_v43, %v2753_v4  ;;  %v2879_v31 = vstv %s2861_s12  ;;  %s2324_s4 = sld [smem:[#allocation5 + $0x4]] }
  0x3e   :  { %v510_v27 = vmul.f32 %v506_v16, %v494_v40  ;;  %v995_v23 = vmax.f32 %v991_v17, 0.0  ;;  %v183_v35 = vmul.f32 %v180_v51, %v2759_v8  ;;  %v193_v37 = vmul.f32 %v190_v52, %v2775_v18  ;;  %s2325_s5 = sld [smem:[#allocation5 + $0x84]] }
  0x3f   :  { %531 = vmatpush.msra.mxu2 %v516_v62  ;;  %v166_v41 = vmul.f32 %v164_v38, %v2747_v2  ;;  %v208_v40 = vadd.f32 %v204_v12, %v198_v28  ;;  %v203_v46 = vmul.f32 %v200_v21, %v2777_v19  ;;  %v177_v48 = vadd.f32 %v173_v29, %v167_v22  ;;  %s2326_s23 = sld [smem:[#allocation5 + $0x104]] }
  0x40   :  { %v514_v42 = vmul.f32 0.16666667, %v510_v27  ;;  %v999_v45 = vmin.f32 %v995_v23, 6.0  ;;  %v172_v49 = vmul.f32 %v170_v43, %v2755_v5  ;;  %v182_v50 = vmul.f32 %v180_v51, %v2761_v9  ;;  %s2327_s24 = sld [smem:[#allocation5 + $0x184]] }
  0x41   :  { %532 = vmatpush.msra.mxu2 %v515_v11  ;;  %v192_v53 = vmul.f32 %v190_v52, %v2785_v25  ;;  %v214_v57 = vadd.f32 %v2879_v31, %v208_v40  ;;  %v202_v36 = vmul.f32 %v200_v21, %v2787_v26  ;;  %v165_v59 = vmul.f32 %v164_v38, %v2794_v32  ;;  %s2328_s25 = sld [smem:[#allocation5 + $0x204]] }
  0x42   :  { %v1003_v54 = vmul.f32 %v999_v45, %v987_v58  ;;  %v187_v60 = vadd.f32 %v183_v35, %v177_v48  ;;  %v176_v61 = vadd.f32 %v172_v49, %v166_v41  ;;  %v171_v62 = vmul.f32 %v170_v43, %v2796_v33  ;;  %v2927_v45 = vld [vmem:[#allocation8 + $0x8] sm:$0xff]  ;;  %s3097_s27 = sld [smem:[#allocation6 + $0x4]] }
  0x43   :  { %533 = vmatpush.msra.mxu2 %v514_v42  ;;  %v181_v13 = vmul.f32 %v180_v51, %v2798_v34  ;;  %v218_v14 = vadd.f32 3.0, %v214_v57  ;;  %v191_v16 = vmul.f32 %v190_v52, %v2804_v39  ;;  %v201_v17 = vmul.f32 %v200_v21, %v2807_v44  ;;  %s2450_s28 = sld [smem:[#allocation5 + $0x7]] }
  0x44   :  { %2204 = vmatmul.msk.f32.vlgmr.msra.gmra.mxu2 %vm235_vm0, %v2889_v47  ;;  %v1007_v58 = vmul.f32 0.16666667, %v1003_v54  ;;  %v197_v20 = vadd.f32 %v193_v37, %v187_v60  ;;  %v186_v38 = vadd.f32 %v182_v50, %v176_v61  ;;  %v175_v11 = vadd.f32 %v171_v62, %v165_v59  ;;  %s2451_s29 = sld [smem:[#allocation5 + $0x87]] }
  0x45   :  { %v2904_v12 = vstv %s2869_s13  ;;  %v222_v43 = vmax.f32 %v218_v14, 0.0  ;;  %v2909_v22 = vstv %s2873_s14  ;;  %v2912_v27 = vstv %s2876_s15  ;;  %s2452_s30 = sld [smem:[#allocation5 + $0x107]] }
  0x46   :  { %1020 = vmatpush.msrb.mxu2 %v1007_v58  ;;  %v696_v51 = vmul.f32 %v2904_v12, %v2741_v0  ;;  %v207_v52 = vadd.f32 %v203_v46, %v197_v20  ;;  %v196_v21 = vadd.f32 %v192_v53, %v186_v38  ;;  %v185_v23 = vadd.f32 %v181_v13, %v175_v11  ;;  %s2453_s7 = sld [smem:[#allocation5 + $0x187]] }
  0x47   :  { %v702_v28 = vmul.f32 %v2909_v22, %v2749_v3  ;;  %v226_v29 = vmin.f32 %v222_v43, 6.0  ;;  %v712_v35 = vmul.f32 %v2912_v27, %v2757_v6  ;;  %v2921_v37 = vstv %s2884_s16  ;;  %s2454_s9 = sld [smem:[#allocation5 + $0x207]] }
  0x48   :  { %v2924_v41 = vstv %s2887_s17  ;;  %v213_v42 = vadd.f32 %v2879_v31, %v207_v52  ;;  %v206_v40 = vadd.f32 %v202_v36, %v196_v21  ;;  %v195_v48 = vadd.f32 %v191_v16, %v185_v23  ;;  %s3266_s10 = sld [smem:[#allocation6 + $0x7]]  ;;  %s2674_s17 = smov 0.0  }
  0x49   :  { %v706_v46 = vadd.f32 %v702_v28, %v696_v51  ;;  %v230_v49 = vmul.f32 %v226_v29, %v214_v57  ;;  %v722_v50 = vmul.f32 %v2921_v37, %v2765_v10  ;;  %v732_v53 = vmul.f32 %v2924_v41, %v2772_v15  ;;  %s2408_s3 = sld [smem:[#allocation5 + $0x6]] }
  0x4a   :  { %v217_v54 = vadd.f32 3.0, %v213_v42  ;;  %v212_v59 = vadd.f32 %v2879_v31, %v206_v40  ;;  %v205_v60 = vadd.f32 %v201_v17, %v195_v48  ;;  %v940_v36 = vmul.f32 %v2822_v55, %v2745_v1  ;;  %v2951_v48 = vld [vmem:[#allocation8 + $0x10] sm:$0xff]  ;;  %s2409_s0 = sld [smem:[#allocation5 + $0x86]] }
  0x4b   :  { %v716_v61 = vadd.f32 %v712_v35, %v706_v46  ;;  %v234_v62 = vmul.f32 0.16666667, %v230_v49  ;;  %v946_v57 = vmul.f32 %v2825_v56, %v2753_v4  ;;  %v2942_v20 = vstv %s2914_s1  ;;  %s2410_s11 = sld [smem:[#allocation5 + $0x106]] }
  0x4c   :  { %2205 = vmatmul.msk.f32.gmra.mxu2 %vm235_vm0, %v2927_v45  ;;  %v221_v13 = vmax.f32 %v217_v54, 0.0  ;;  %v216_v58 = vadd.f32 3.0, %v212_v59  ;;  %v211_v14 = vadd.f32 %v2879_v31, %v205_v60  ;;  %v956_v38 = vmul.f32 %v2836_v63, %v2759_v8  ;;  %s2411_s13 = sld [smem:[#allocation5 + $0x186]] }
  0x4d   :  { %v726_v16 = vadd.f32 %v722_v50, %v716_v61  ;;  %284 = vmatpush.msra.mxu0 %v234_v62  ;;  %v950_v17 = vadd.f32 %v946_v57, %v940_v36  ;;  %v966_v11 = vmul.f32 %v2839_v7, %v2775_v18  ;;  %v976_v28 = vmul.f32 %v2848_v24, %v2777_v19  ;;  %s2412_s14 = sld [smem:[#allocation5 + $0x206]] }
  0x4e   :  { %v225_v43 = vmin.f32 %v221_v13, 6.0  ;;  %v220_v51 = vmax.f32 %v216_v58, 0.0  ;;  %v215_v52 = vadd.f32 3.0, %v211_v14  ;;  %v695_v49 = vmul.f32 %v2904_v12, %v2745_v1  ;;  %s3302_s15 = sld [smem:[#allocation6 + $0x6]] }
  0x4f   :  { %v736_v21 = vadd.f32 %v732_v53, %v726_v16  ;;  %v960_v23 = vadd.f32 %v956_v38, %v950_v17  ;;  %v701_v50 = vmul.f32 %v2909_v22, %v2753_v4  ;;  %v711_v53 = vmul.f32 %v2912_v27, %v2759_v8  ;;  %s571_s16 = sadd.f32 3.0, %s2751_s26 }
  0x50   :  { %v229_v31 = vmul.f32 %v225_v43, %v213_v42  ;;  %v224_v29 = vmin.f32 %v220_v51, 6.0  ;;  %v219_v35 = vmax.f32 %v215_v52, 0.0  ;;  %v721_v57 = vmul.f32 %v2921_v37, %v2775_v18 }
  0x51   :  { %v742_v40 = vadd.f32 %v2942_v20, %v736_v21  ;;  %v970_v46 = vadd.f32 %v966_v11, %v960_v23  ;;  %v705_v36 = vadd.f32 %v701_v50, %v695_v49  ;;  %v2966_v23 = vld [vmem:[#allocation8 + $0x18] sm:$0xff] }
  0x52   :  { %v233_v54 = vmul.f32 0.16666667, %v229_v31  ;;  %v228_v60 = vmul.f32 %v224_v29, %v212_v59  ;;  %v223_v61 = vmin.f32 %v219_v35, 6.0  ;;  %v731_v59 = vmul.f32 %v2924_v41, %v2777_v19 }
  0x53   :  { %v746_v42 = vadd.f32 3.0, %v742_v40  ;;  %v980_v62 = vadd.f32 %v976_v28, %v970_v46  ;;  %v715_v38 = vadd.f32 %v711_v53, %v705_v36  ;;  %v939_v31 = vmul.f32 %v2822_v55, %v2747_v2 }
  0x54   :  { %2206 = vmatmul.msk.f32.gmra.mxu2 %vm235_vm0, %v2951_v48  ;;  %285 = vmatpush.msra.mxu0 %v233_v54  ;;  %v232_v13 = vmul.f32 0.16666667, %v228_v60  ;;  %v227_v58 = vmul.f32 %v223_v61, %v211_v14  ;;  %v945_v29 = vmul.f32 %v2825_v56, %v2755_v5  ;;  %v955_v46 = vmul.f32 %v2836_v63, %v2761_v9 }
  0x55   :  { %v750_v16 = vmax.f32 %v746_v42, 0.0  ;;  %v986_v17 = vadd.f32 %v2853_v30, %v980_v62  ;;  %v725_v52 = vadd.f32 %v721_v57, %v715_v38  ;;  %v965_v53 = vmul.f32 %v2839_v7, %v2785_v25 }
  0x56   :  { %286 = vmatpush.msra.mxu0 %v232_v13  ;;  %v231_v11 = vmul.f32 0.16666667, %v227_v58  ;;  %v949_v50 = vadd.f32 %v945_v29, %v939_v31  ;;  %v975_v42 = vmul.f32 %v2848_v24, %v2787_v26  ;;  %v2983_v13 = vld [vmem:[#allocation8 + $0x20] sm:$0xff] }
  0x57   :  { %v754_v43 = vmin.f32 %v750_v16, 6.0  ;;  %v990_v51 = vadd.f32 3.0, %v986_v17  ;;  %v735_v28 = vadd.f32 %v731_v59, %v725_v52 }
  0x58   :  { %287 = vmatpush.msra.mxu0 %v231_v11  ;;  %v959_v61 = vadd.f32 %v955_v46, %v949_v50 }
  0x59   :  { %v758_v21 = vmul.f32 %v754_v43, %v742_v40  ;;  %2174 = vmatmul.msk.f32.vlgmr.msra.gmra.mxu0 %vm235_vm0, %v2889_v47  ;;  %v994_v14 = vmax.f32 %v990_v51, 0.0  ;;  %v741_v49 = vadd.f32 %v2942_v20, %v735_v28  ;;  %v2990_v51 = vld [vmem:[#allocation8 + $0x28] sm:$0xff]  ;;  %v710_v28 = vmul.f32 %v2912_v27, %v2761_v9 }
  0x5a   :  { %v969_v57 = vadd.f32 %v965_v53, %v959_v61  ;;  %v3006_v53 = vld [vmem:[#allocation8 + $0x30] sm:$0xff]  ;;  %v944_v61 = vmul.f32 %v2825_v56, %v2796_v33  ;;  %v3023_v56 = vld [vmem:[#allocation8 + $0x38] sm:$0xff] }
  0x5b   :  { %v762_v35 = vmul.f32 0.16666667, %v758_v21  ;;  %v998_v40 = vmin.f32 %v994_v14, 6.0  ;;  %v745_v60 = vadd.f32 3.0, %v741_v49  ;;  %v694_v21 = vmul.f32 %v2904_v12, %v2747_v2 }
  0x5c   :  { %2207 = vmatmul.msk.f32.gmra.mxu2 %vm235_vm0, %v2966_v23  ;;  %v979_v16 = vadd.f32 %v975_v42, %v969_v57  ;;  %v700_v14 = vmul.f32 %v2909_v22, %v2755_v5  ;;  %v954_v42 = vmul.f32 %v2836_v63, %v2798_v34  ;;  %v964_v57 = vmul.f32 %v2839_v7, %v2804_v39 }
  0x5d   :  { %775 = vmatpush.msrb.mxu0 %v762_v35  ;;  %v1002_v54 = vmul.f32 %v998_v40, %v986_v17  ;;  %v749_v36 = vmax.f32 %v745_v60, 0.0  ;;  %v720_v35 = vmul.f32 %v2921_v37, %v2785_v25  ;;  %v938_v60 = vmul.f32 %v2822_v55, %v2794_v32 }
  0x5e   :  { %v985_v38 = vadd.f32 %v2853_v30, %v979_v16  ;;  %v704_v29 = vadd.f32 %v700_v14, %v694_v21  ;;  %v974_v55 = vmul.f32 %v2848_v24, %v2807_v44  ;;  %v3030_v24 = vld [vmem:[#allocation8 + $0x40] sm:$0xff] }
  0x5f   :  { %v1006_v62 = vmul.f32 0.16666667, %v1002_v54  ;;  %v753_v58 = vmin.f32 %v749_v36, 6.0  ;;  %v948_v36 = vadd.f32 %v944_v61, %v938_v60  ;;  %v3052_v60 = vstv %s2367_s19  ;;  %s2675_s19 = smov 6.0  }
  0x60   :  { %v989_v11 = vadd.f32 3.0, %v985_v38  ;;  %v714_v40 = vadd.f32 %v710_v28, %v704_v29  ;;  %v693_v28 = vmul.f32 %v2904_v12, %v2794_v32  ;;  %v729_v12 = vmul.f32 %v2924_v41, %v2807_v44 }
  0x61   :  { %2175 = vmatmul.msk.f32.gmra.mxu0 %vm235_vm0, %v2927_v45  ;;  %1021 = vmatpush.msrb.mxu2 %v1006_v62  ;;  %v757_v17 = vmul.f32 %v753_v58, %v741_v49  ;;  %v730_v49 = vmul.f32 %v2924_v41, %v2787_v26  ;;  %v958_v16 = vadd.f32 %v954_v42, %v948_v36  ;;  %v3054_v61 = vstv %s2368_s20 }
  0x62   :  { %v993_v43 = vmax.f32 %v989_v11, 0.0  ;;  %v724_v50 = vadd.f32 %v720_v35, %v714_v40  ;;  %v1437_v41 = vmul.f32 %v3052_v60, %v2749_v3  ;;  %v1447_v42 = vmul.f32 %v3054_v61, %v2757_v6 }
  0x63   :  { %v761_v59 = vmul.f32 0.16666667, %v757_v17 }
  0x64   :  { %2208 = vmatmul.msk.f32.gmra.mxu2 %vm235_vm0, %v2983_v13  ;;  %v997_v52 = vmin.f32 %v993_v43, 6.0  ;;  %v734_v54 = vadd.f32 %v730_v49, %v724_v50  ;;  %v3046_v50 = vld [vmem:[#allocation8 + $0x48] sm:$0xff] }
  0x65   :  { %776 = vmatpush.msrb.mxu0 %v761_v59 }
  0x66   :  { %v1001_v31 = vmul.f32 %v997_v52, %v985_v38  ;;  %v740_v62 = vadd.f32 %v2942_v20, %v734_v54  ;;  %v968_v38 = vadd.f32 %v964_v57, %v958_v16  ;;  %v3050_v54 = vstv %s2366_s18  ;;  %s572_s18 = smax.f32 %s2674_s17, %s571_s16  ;;  %s1061_s16 = sadd.f32 3.0, %s2815_s8 }
  0x67   :  { %v3069_v57 = vstv %s2370_s2  ;;  %s573_s20 = smin.f32 %s2675_s19, %s572_s18  ;;  %s325_s2 = sadd.f32 3.0, %s2861_s12 }
  0x68   :  { %v1005_v46 = vmul.f32 0.16666667, %v1001_v31  ;;  %v744_v58 = vadd.f32 3.0, %v740_v62  ;;  %v978_v59 = vadd.f32 %v974_v55, %v968_v38  ;;  %v699_v31 = vmul.f32 %v2909_v22, %v2796_v33 }
  0x69   :  { %2176 = vmatmul.msk.f32.gmra.mxu0 %vm235_vm0, %v2951_v48  ;;  %v1467_v38 = vmul.f32 %v3069_v57, %v2772_v15 }
  0x6a   :  { %1022 = vmatpush.msrb.mxu2 %v1005_v46  ;;  %v748_v17 = vmax.f32 %v744_v58, 0.0  ;;  %v984_v7 = vadd.f32 %v2853_v30, %v978_v59  ;;  %v709_v30 = vmul.f32 %v2912_v27, %v2798_v34  ;;  %v703_v35 = vadd.f32 %v699_v31, %v693_v28  ;;  %v3075_v59 = vld [vmem:[#allocation8 + $0x50] sm:$0xff]  ;;  %v3085_v31 = vld [vmem:[#allocation8 + $0x58] sm:$0x7f] }
  0x6b   :  { %v719_v46 = vmul.f32 %v2921_v37, %v2804_v39  ;;  %v1431_v37 = vmul.f32 %v3050_v54, %v2741_v0 }
  0x6c   :  { %2209 = vmatmul.msk.f32.gmra.mxu2 %vm235_vm0, %v2990_v51  ;;  %v752_v63 = vmin.f32 %v748_v17, 6.0  ;;  %v988_v52 = vadd.f32 3.0, %v984_v7  ;;  %v713_v49 = vadd.f32 %v709_v30, %v703_v35  ;;  %v3091_v35 = vstv %s2325_s5  ;;  %s326_s5 = smax.f32 %s2674_s17, %s325_s2 }
  0x6d   :  { %v1441_v58 = vadd.f32 %v1437_v41, %v1431_v37  ;;  %v3107_v37 = vstv %s2328_s25 }
  0x6e   :  { %v756_v11 = vmul.f32 %v752_v63, %v740_v62  ;;  %v992_v21 = vmax.f32 %v988_v52, 0.0  ;;  %v723_v22 = vadd.f32 %v719_v46, %v713_v49  ;;  %v3064_v62 = vstv %s2369_s21  ;;  %s574_s21 = smul.f32 %s2751_s26, %s573_s20  ;;  %s327_s26 = smin.f32 %s2675_s19, %s326_s5 }
  0x6f   :  { %v1457_v16 = vmul.f32 %v3064_v62, %v2765_v10  ;;  %v1451_v17 = vadd.f32 %v1447_v42, %v1441_v58  ;;  %v3093_v46 = vstv %s2326_s23  ;;  %s328_s23 = smul.f32 %s327_s26, %s2861_s12  ;;  %s1551_s12 = sadd.f32 3.0, %s3056_s22 }
  0x70   :  { %v760_v43 = vmul.f32 0.16666667, %v756_v11  ;;  %v996_v14 = vmin.f32 %v992_v21, 6.0  ;;  %v733_v27 = vadd.f32 %v729_v12, %v723_v22  ;;  %v1192_v22 = vmul.f32 %v3091_v35, %v2749_v3 }
  0x71   :  { %2177 = vmatmul.msk.f32.gmra.mxu0 %vm235_vm0, %v2966_v23  ;;  %v1461_v11 = vadd.f32 %v1457_v16, %v1451_v17  ;;  %v1436_v17 = vmul.f32 %v3052_v60, %v2753_v4 }
  0x72   :  { %777 = vmatpush.msrb.mxu0 %v760_v43  ;;  %v1000_v29 = vmul.f32 %v996_v14, %v984_v7  ;;  %v739_v36 = vadd.f32 %v2942_v20, %v733_v27  ;;  %v3080_v7 = vstv %s3056_s22  ;;  %v1202_v27 = vmul.f32 %v3093_v46, %v2757_v6 }
  0x73   :  { %v1471_v43 = vadd.f32 %v1467_v38, %v1461_v11  ;;  %v3116_v6 = vstv %s3097_s27 }
  0x74   :  { %2210 = vmatmul.msk.f32.gmra.mxu2 %vm235_vm0, %v3006_v53  ;;  %v1004_v40 = vmul.f32 0.16666667, %v1000_v29  ;;  %v743_v55 = vadd.f32 3.0, %v739_v36  ;;  %v3089_v29 = vstv %s2324_s4  ;;  %s575_s4 = smul.f32 0.16666667, %s574_s21  ;;  %s1062_s21 = smax.f32 %s2674_s17, %s1061_s16 }
  0x75   :  { %v1477_v21 = vadd.f32 %v3080_v7, %v1471_v43  ;;  %v1186_v12 = vmul.f32 %v3089_v29, %v2741_v0  ;;  %v1222_v0 = vmul.f32 %v3107_v37, %v2772_v15  ;;  %v1466_v43 = vmul.f32 %v3069_v57, %v2777_v19  ;;  %s1063_s5 = smin.f32 %s2675_s19, %s1062_s21 }
  0x76   :  { %1023 = vmatpush.msrb.mxu2 %v1004_v40  ;;  %v747_v63 = vmax.f32 %v743_v55, 0.0  ;;  %v3095_v40 = vstv %s2327_s24  ;;  %v1430_v55 = vmul.f32 %v3050_v54, %v2745_v1  ;;  %s329_s24 = smul.f32 0.16666667, %s328_s23  ;;  %s816_s23 = sadd.f32 3.0, %s2914_s1 }
  0x77   :  { %v1481_v28 = vadd.f32 3.0, %v1477_v21  ;;  %v1196_v42 = vadd.f32 %v1192_v22, %v1186_v12  ;;  %s1064_s26 = smul.f32 %s2815_s8, %s1063_s5 }
  0x78   :  { %v751_v20 = vmin.f32 %v747_v63, 6.0  ;;  %v1440_v15 = vadd.f32 %v1436_v17, %v1430_v55  ;;  %v1456_v63 = vmul.f32 %v3064_v62, %v2775_v18  ;;  %v1191_v55 = vmul.f32 %v3091_v35, %v2753_v4 }
  0x79   :  { %2178 = vmatmul.msk.f32.gmra.mxu0 %vm235_vm0, %v2983_v13  ;;  %v1485_v30 = vmax.f32 %v1481_v28, 0.0  ;;  %v1206_v16 = vadd.f32 %v1202_v27, %v1196_v42  ;;  %v3142_v27 = vld [vmem:[#allocation10 + $0x8] sm:$0xff]  ;;  %v1201_v17 = vmul.f32 %v3093_v46, %v2759_v8  ;;  %v1221_v4 = vmul.f32 %v3107_v37, %v2777_v19  ;;  %s1065_s8 = smul.f32 0.16666667, %s1064_s26 }
  0x7a   :  { %v755_v52 = vmul.f32 %v751_v20, %v739_v36  ;;  %v1212_v36 = vmul.f32 %v3095_v40, %v2765_v10  ;;  %v1446_v10 = vmul.f32 %v3054_v61, %v2759_v8  ;;  %v1435_v19 = vmul.f32 %v3052_v60, %v2755_v5 }
  0x7b   :  { %v1489_v49 = vmin.f32 %v1485_v30, 6.0  ;;  %v3133_v30 = vld [vmem:[#allocation10 + $0x18] sm:$0xff] }
  0x7c   :  { %2211 = vmatmul.msk.f32.gmra.mxu2 %vm235_vm0, %v3023_v56  ;;  %v759_v14 = vmul.f32 0.16666667, %v755_v52  ;;  %v1216_v3 = vadd.f32 %v1212_v36, %v1206_v16  ;;  %v1450_v20 = vadd.f32 %v1446_v10, %v1440_v15  ;;  %637 = vmatpush.msra.mxu3 %v3133_v30  ;;  %v3146_v36 = vld [vmem:[#allocation10] sm:$0xff]  ;;  %v1211_v15 = vmul.f32 %v3095_v40, %v2775_v18 }
  0x7d   :  { %v1493_v41 = vmul.f32 %v1489_v49, %v1477_v21  ;;  %v3135_v49 = vld [vmem:[#allocation10 + $0x10] sm:$0xff]  ;;  %391 = vmatpush.msra.mxu1 %v3133_v30 }
  0x7e   :  { %778 = vmatpush.msrb.mxu0 %v759_v14  ;;  %v1226_v38 = vadd.f32 %v1222_v0, %v1216_v3  ;;  %v1460_v21 = vadd.f32 %v1456_v63, %v1450_v20  ;;  %638 = vmatpush.msra.mxu3 %v3135_v49  ;;  %v1185_v3 = vmul.f32 %v3089_v29, %v2745_v1 }
  0x7f   :  { %v1497_v58 = vmul.f32 0.16666667, %v1493_v41  ;;  %392 = vmatpush.msra.mxu1 %v3135_v49  ;;  %v1445_v20 = vmul.f32 %v3054_v61, %v2761_v9 }
  0x80   :  { %v1232_v11 = vadd.f32 %v3116_v6, %v1226_v38  ;;  %v1470_v28 = vadd.f32 %v1466_v43, %v1460_v21  ;;  %639 = vmatpush.msra.mxu3 %v3142_v27  ;;  %v1195_v38 = vadd.f32 %v1191_v55, %v1185_v3  ;;  %v1455_v21 = vmul.f32 %v3064_v62, %v2785_v25 }
  0x81   :  { %2179 = vmatmul.msk.f32.gmra.mxu0 %vm235_vm0, %v2990_v51  ;;  %1510 = vmatpush.msra.mxu2 %v1497_v58 }
  0x82   :  { %v1236_v52 = vadd.f32 3.0, %v1232_v11  ;;  %v1476_v22 = vadd.f32 %v3080_v7, %v1470_v28  ;;  %393 = vmatpush.msra.mxu1 %v3142_v27  ;;  %640 = vmatpush.msra.mxu3 %v3146_v36  ;;  %v1205_v63 = vadd.f32 %v1201_v17, %v1195_v38 }
  0x84   :  { %2212 = vmatmul.msk.f32.gmra.mxu2 %vm235_vm0, %v3030_v24  ;;  %v1240_v14 = vmax.f32 %v1236_v52, 0.0  ;;  %v1480_v42 = vadd.f32 3.0, %v1476_v22  ;;  %1127 = vmatpush.msrb.mxu3 %v3133_v30  ;;  %v1215_v8 = vadd.f32 %v1211_v15, %v1205_v63  ;;  %v1184_v15 = vmul.f32 %v3089_v29, %v2747_v2 }
  0x85   :  { %394 = vmatpush.msra.mxu1 %v3146_v36  ;;  %v1200_v63 = vmul.f32 %v3093_v46, %v2761_v9 }
  0x86   :  { %v1244_v12 = vmin.f32 %v1240_v14, 6.0  ;;  %v1484_v16 = vmax.f32 %v1480_v42, 0.0  ;;  %1128 = vmatpush.msrb.mxu3 %v3135_v49  ;;  %v1225_v18 = vadd.f32 %v1221_v4, %v1215_v8 }
  0x87   :  { %882 = vmatpush.msrb.mxu1 %v3133_v30 }
  0x88   :  { %v1248_v41 = vmul.f32 %v1244_v12, %v1232_v11  ;;  %v1488_v0 = vmin.f32 %v1484_v16, 6.0  ;;  %1129 = vmatpush.msrb.mxu3 %v3142_v27  ;;  %v1429_v11 = vmul.f32 %v3050_v54, %v2747_v2  ;;  %v1231_v43 = vadd.f32 %v3116_v6, %v1225_v18 }
  0x89   :  { %2180 = vmatmul.msk.f32.gmra.mxu0 %vm235_vm0, %v3006_v53  ;;  %883 = vmatpush.msrb.mxu1 %v3135_v49  ;;  %v1465_v12 = vmul.f32 %v3069_v57, %v2787_v26  ;;  %v1210_v18 = vmul.f32 %v3095_v40, %v2785_v25  ;;  %v1428_v25 = vmul.f32 %v3050_v54, %v2794_v32 }
  0x8a   :  { %v1252_v58 = vmul.f32 0.16666667, %v1248_v41  ;;  %v1492_v10 = vmul.f32 %v1488_v0, %v1476_v22  ;;  %1130 = vmatpush.msrb.mxu3 %v3146_v36  ;;  %v1439_v52 = vadd.f32 %v1435_v19, %v1429_v11  ;;  %v1235_v14 = vadd.f32 3.0, %v1231_v43 }
  0x8b   :  { %884 = vmatpush.msrb.mxu1 %v3142_v27  ;;  %v1464_v54 = vmul.f32 %v3069_v57, %v2807_v44 }
  0x8c   :  { %2213 = vmatmul.msk.f32.gmra.mxu2 %vm235_vm0, %v3046_v50  ;;  %1265 = vmatpush.msra.mxu0 %v1252_v58  ;;  %v1496_v1 = vmul.f32 0.16666667, %v1492_v10  ;;  %v1449_v28 = vadd.f32 %v1445_v20, %v1439_v52  ;;  %v1239_v22 = vmax.f32 %v1235_v14, 0.0  ;;  %v1454_v14 = vmul.f32 %v3064_v62, %v2804_v39 }
  0x8d   :  { %885 = vmatpush.msrb.mxu1 %v3146_v36 }
  0x8e   :  { %1511 = vmatpush.msra.mxu2 %v1496_v1  ;;  %v1459_v41 = vadd.f32 %v1455_v21, %v1449_v28  ;;  %v1243_v42 = vmin.f32 %v1239_v22, 6.0  ;;  %v1190_v1 = vmul.f32 %v3091_v35, %v2755_v5  ;;  %v1220_v5 = vmul.f32 %v3107_v37, %v2787_v26 }
  0x8f   :  { %v1444_v26 = vmul.f32 %v3054_v61, %v2798_v34 }
  0x90   :  { %v1469_v58 = vadd.f32 %v1465_v12, %v1459_v41  ;;  %v1247_v16 = vmul.f32 %v1243_v42, %v1231_v43  ;;  %v1194_v8 = vadd.f32 %v1190_v1, %v1184_v15  ;;  %v1434_v43 = vmul.f32 %v3052_v60, %v2796_v33 }
  0x91   :  { %2181 = vmatmul.msk.f32.gmra.mxu0 %vm235_vm0, %v3023_v56  ;;  %v1199_v15 = vmul.f32 %v3093_v46, %v2798_v34  ;;  %v3260_v46 = vstv %s2450_s28 }
  0x92   :  { %v1475_v0 = vadd.f32 %v3080_v7, %v1469_v58  ;;  %v1251_v3 = vmul.f32 0.16666667, %v1247_v16  ;;  %v1204_v2 = vadd.f32 %v1200_v63, %v1194_v8  ;;  %v1438_v21 = vadd.f32 %v1434_v43, %v1428_v25 }
  0x93   :  { %v3276_v25 = vstv %s2454_s9  ;;  %s1306_s9 = sadd.f32 3.0, %s3097_s27 }
  0x94   :  { %2214 = vmatmul.msk.f32.gmra.mxu2 %vm235_vm0, %v3075_v59  ;;  %v1479_v55 = vadd.f32 3.0, %v1475_v0  ;;  %1266 = vmatpush.msra.mxu0 %v1251_v3  ;;  %v1214_v9 = vadd.f32 %v1210_v18, %v1204_v2  ;;  %v1448_v12 = vadd.f32 %v1444_v26, %v1438_v21  ;;  %v2505_v26 = vld [vmem:[#allocation2 + $0x78] sm:$0xff] }
  0x96   :  { %v1483_v10 = vmax.f32 %v1479_v55, 0.0  ;;  %v1224_v20 = vadd.f32 %v1220_v5, %v1214_v9  ;;  %v1458_v61 = vadd.f32 %v1454_v14, %v1448_v12  ;;  %v2504_v5 = vld [vmem:[#allocation2 + $0x58] sm:$0xff]  ;;  %v3271_v9 = vstv %s2453_s7 }
  0x98   :  { %v1487_v38 = vmin.f32 %v1483_v10, 6.0  ;;  %v1230_v52 = vadd.f32 %v3116_v6, %v1224_v20  ;;  %v1468_v62 = vadd.f32 %v1464_v54, %v1458_v61  ;;  %v1183_v10 = vmul.f32 %v3089_v29, %v2794_v32  ;;  %v2506_v54 = vld [vmem:[#allocation2 + $0x98] sm:$0xff] }
  0x99   :  { %2182 = vmatmul.msk.f32.gmra.mxu0 %vm235_vm0, %v3030_v24  ;;  %v1219_v32 = vmul.f32 %v3107_v37, %v2807_v44  ;;  %v2502_v44 = vld [vmem:[#allocation2 + $0x18] sm:$0xff]  ;;  %v3285_v61 = vstv %s3266_s10 }
  0x9a   :  { %v1491_v4 = vmul.f32 %v1487_v38, %v1475_v0  ;;  %v1234_v28 = vadd.f32 3.0, %v1230_v52  ;;  %v1474_v58 = vadd.f32 %v3080_v7, %v1468_v62  ;;  %v1189_v38 = vmul.f32 %v3091_v35, %v2796_v33 }
  0x9b   :  { %v1921_v37 = vmul.f32 %v2502_v44, %v3260_v46 }
  0x9c   :  { %2215 = vmatmul.msk.f32.gmra.mxu2 %vm235_vm0, %v3085_v31  ;;  %v1495_v11 = vmul.f32 0.16666667, %v1491_v4  ;;  %v1238_v60 = vmax.f32 %v1234_v28, 0.0  ;;  %v1478_v0 = vadd.f32 3.0, %v1474_v58  ;;  %v1193_v63 = vadd.f32 %v1189_v38, %v1183_v10 }
  0x9d   :  { %v1209_v4 = vmul.f32 %v3095_v40, %v2804_v39  ;;  %v3262_v39 = vstv %s2451_s29  ;;  %v3264_v40 = vstv %s2452_s30  ;;  %v3298_v10 = vstv %s2410_s11  ;;  %s817_s29 = smax.f32 %s2674_s17, %s816_s23 }
  0x9e   :  { %1512 = vmatpush.msra.mxu2 %v1495_v11  ;;  %v1242_v42 = vmin.f32 %v1238_v60, 6.0  ;;  %v1203_v18 = vadd.f32 %v1199_v15, %v1193_v63  ;;  %v2503_v11 = vld [vmem:[#allocation2 + $0x38] sm:$0xff]  ;;  %v3300_v38 = vstv %s2411_s13  ;;  %s818_s30 = smin.f32 %s2675_s19, %s817_s29 }
  0x9f   :  { %v1927_v2 = vmul.f32 %v2503_v11, %v3262_v39 }
  0xa0   :  { %v1246_v57 = vmul.f32 %v1242_v42, %v1230_v52  ;;  %v1213_v34 = vadd.f32 %v1209_v4, %v1203_v18  ;;  %v1947_v52 = vmul.f32 %v2505_v26, %v3271_v9  ;;  %v1692_v4 = vmul.f32 %v2504_v5, %v3298_v10 }
  0xa1   :  { %2183 = vmatmul.msk.f32.gmra.mxu0 %vm235_vm0, %v3046_v50  ;;  %v1931_v43 = vadd.f32 %v1927_v2, %v1921_v37  ;;  %v3318_v2 = vstv %s3302_s15 }
  0xa2   :  { %v1250_v16 = vmul.f32 0.16666667, %v1246_v57  ;;  %v1223_v35 = vadd.f32 %v1219_v32, %v1213_v34 }
  0xa4   :  { %2288 = vmatmul.msk.f32.vlgmr.msrb.gmra.mxu2 %vm235_vm0, %v2889_v47  ;;  %1267 = vmatpush.msra.mxu0 %v1250_v16  ;;  %v1229_v20 = vadd.f32 %v3116_v6, %v1223_v35 }
  0xa6   :  { %v1233_v21 = vadd.f32 3.0, %v1229_v20 }
  0xa8   :  { %v1237_v6 = vmax.f32 %v1233_v21, 0.0 }
  0xa9   :  { %2184 = vmatmul.msk.f32.gmra.mxu0 %vm235_vm0, %v3075_v59 }
  0xaa   :  { %v1241_v60 = vmin.f32 %v1237_v6, 6.0  ;;  %v2511_v6 = vld [vmem:[#allocation2 + $0x90] sm:$0xff] }
  0xac   :  { %2289 = vmatmul.msk.f32.gmra.mxu2 %vm235_vm0, %v2927_v45  ;;  %v1245_v62 = vmul.f32 %v1241_v60, %v1229_v20  ;;  %v2508_v20 = vld [vmem:[#allocation2 + $0x30] sm:$0xff] }
  0xb1   :  { %2185 = vmatmul.msk.f32.gmra.mxu0 %vm235_vm0, %v3085_v31 }
  0xb4   :  { %2290 = vmatmul.msk.f32.gmra.mxu2 %vm235_vm0, %v2951_v48 }
  0xb9   :  { %2246 = vmatmul.msk.f32.vlgmr.msrb.gmra.mxu0 %vm235_vm0, %v2889_v47 }
  0xbc   :  { %2291 = vmatmul.msk.f32.gmra.mxu2 %vm235_vm0, %v2966_v23 }
  0xc1   :  { %2247 = vmatmul.msk.f32.gmra.mxu0 %vm235_vm0, %v2927_v45 }
  0xc4   :  { %2292 = vmatmul.msk.f32.gmra.mxu2 %vm235_vm0, %v2983_v13 }
  0xc7   :  { %v535_v17 = vpop.f32.mrf.mxu2 }
  0xc8   :  { %2216 = vmatmul.msk.f32.vlgmr.msra.gmra.mxu3 %vm235_vm0, %v535_v17  ;;  %v1482_v17 = vmax.f32 %v1478_v0, 0.0 }
  0xc9   :  { %1617 = vmatpush.msra.mxu3 %v3133_v30  ;;  %2248 = vmatmul.msk.f32.gmra.mxu0 %vm235_vm0, %v2951_v48 }
  0xca   :  { %v1486_v7 = vmin.f32 %v1482_v17, 6.0  ;;  %v3294_v17 = vstv %s2408_s3  ;;  %s819_s3 = smul.f32 %s2914_s1, %s818_s30 }
  0xcb   :  { %1618 = vmatpush.msra.mxu3 %v3135_v49 }
  0xcc   :  { %2293 = vmatmul.msk.f32.gmra.mxu2 %vm235_vm0, %v2990_v51  ;;  %v1490_v1 = vmul.f32 %v1486_v7, %v1474_v58  ;;  %v1249_v58 = vmul.f32 0.16666667, %v1245_v62  ;;  %v3296_v7 = vstv %s2409_s0  ;;  %s820_s1 = smul.f32 0.16666667, %s819_s3 }
  0xcd   :  { %1619 = vmatpush.msra.mxu3 %v3142_v27  ;;  %v1682_v63 = vmul.f32 %v2503_v11, %v3296_v7 }
  0xce   :  { %v1494_v8 = vmul.f32 0.16666667, %v1490_v1  ;;  %1268 = vmatpush.msra.mxu0 %v1249_v58  ;;  %v1676_v1 = vmul.f32 %v2502_v44, %v3294_v17 }
  0xcf   :  { %v538_v19 = vpop.f32.mrf.mxu2  ;;  %1620 = vmatpush.msra.mxu3 %v3146_v36 }
  0xd0   :  { %2217 = vmatmul.msk.f32.gmra.mxu3 %vm235_vm0, %v538_v19  ;;  %1513 = vmatpush.msra.mxu2 %v1494_v8  ;;  %v1937_v19 = vmul.f32 %v2504_v5, %v3264_v40  ;;  %v3309_v8 = vstv %s2412_s14  ;;  %v1686_v32 = vadd.f32 %v1682_v63, %v1676_v1  ;;  %v2507_v5 = vld [vmem:[#allocation2 + $0x10] sm:$0xff] }
  0xd1   :  { %2249 = vmatmul.msk.f32.gmra.mxu0 %vm235_vm0, %v2966_v23  ;;  %v1712_v44 = vmul.f32 %v2506_v54, %v3309_v8 }
  0xd2   :  { %v1941_v12 = vadd.f32 %v1937_v19, %v1931_v43  ;;  %v1696_v37 = vadd.f32 %v1692_v4, %v1686_v32  ;;  %v1920_v19 = vmul.f32 %v2507_v5, %v3260_v46  ;;  %v1926_v43 = vmul.f32 %v2508_v20, %v3262_v39 }
  0xd3   :  { %v1675_v32 = vmul.f32 %v2507_v5, %v3294_v17 }
  0xd4   :  { %2294 = vmatmul.msk.f32.gmra.mxu2 %vm235_vm0, %v3006_v53 }
  0xd6   :  { %v289_v22 = vpop.f32.mrf.mxu0 }
  0xd7   :  { %v541_v41 = vpop.f32.mrf.mxu2  ;;  %2186 = vmatmul.msk.f32.vlgmr.msra.gmra.mxu1 %vm235_vm0, %v289_v22  ;;  %v1957_v22 = vmul.f32 %v2506_v54, %v3276_v25 }
  0xd8   :  { %2218 = vmatmul.msk.f32.gmra.mxu3 %vm235_vm0, %v541_v41  ;;  %1372 = vmatpush.msra.mxu1 %v3133_v30  ;;  %v1951_v41 = vadd.f32 %v1947_v52, %v1941_v12 }
  0xd9   :  { %2250 = vmatmul.msk.f32.gmra.mxu0 %vm235_vm0, %v2983_v13 }
  0xda   :  { %1373 = vmatpush.msra.mxu1 %v3135_v49  ;;  %v1961_v42 = vadd.f32 %v1957_v22, %v1951_v41  ;;  %v1956_v41 = vmul.f32 %v2511_v6, %v3276_v25 }
  0xdc   :  { %2295 = vmatmul.msk.f32.gmra.mxu2 %vm235_vm0, %v3023_v56  ;;  %1374 = vmatpush.msra.mxu1 %v3142_v27  ;;  %v1967_v57 = vadd.f32 %v3285_v61, %v1961_v42 }
  0xde   :  { %v292_v3 = vpop.f32.mrf.mxu0  ;;  %1375 = vmatpush.msra.mxu1 %v3146_v36 }
  0xdf   :  { %v544_v55 = vpop.f32.mrf.mxu2  ;;  %2187 = vmatmul.msk.f32.gmra.mxu1 %vm235_vm0, %v292_v3  ;;  %v1971_v3 = vadd.f32 3.0, %v1967_v57 }
  0xe0   :  { %2219 = vmatmul.msk.f32.gmra.mxu3 %vm235_vm0, %v544_v55 }
  0xe1   :  { %2251 = vmatmul.msk.f32.gmra.mxu0 %vm235_vm0, %v2990_v51  ;;  %v1975_v55 = vmax.f32 %v1971_v3, 0.0 }
  0xe3   :  { %v1979_v15 = vmin.f32 %v1975_v55, 6.0 }
  0xe4   :  { %2296 = vmatmul.msk.f32.gmra.mxu2 %vm235_vm0, %v3030_v24 }
  0xe5   :  { %v1983_v18 = vmul.f32 %v1979_v15, %v1967_v57 }
  0xe6   :  { %v295_v33 = vpop.f32.mrf.mxu0 }
  0xe7   :  { %v547_v29 = vpop.f32.mrf.mxu2  ;;  %2188 = vmatmul.msk.f32.gmra.mxu1 %vm235_vm0, %v295_v33  ;;  %v1702_v33 = vmul.f32 %v2505_v26, %v3300_v38  ;;  %v1987_v35 = vmul.f32 0.16666667, %v1983_v18  ;;  %v2509_v26 = vld [vmem:[#allocation2 + $0x50] sm:$0xff] }
  0xe8   :  { %2220 = vmatmul.msk.f32.gmra.mxu3 %vm235_vm0, %v547_v29  ;;  %v1936_v52 = vmul.f32 %v2509_v26, %v3264_v40 }
  0xe9   :  { %2252 = vmatmul.msk.f32.gmra.mxu0 %vm235_vm0, %v3006_v53  ;;  %2000 = vmatpush.msrb.mxu2 %v1987_v35  ;;  %v1706_v11 = vadd.f32 %v1702_v33, %v1696_v37  ;;  %v1691_v33 = vmul.f32 %v2509_v26, %v3298_v10 }
  0xeb   :  { %v1716_v21 = vadd.f32 %v1712_v44, %v1706_v11  ;;  %v1711_v11 = vmul.f32 %v2511_v6, %v3309_v8 }
  0xec   :  { %2297 = vmatmul.msk.f32.gmra.mxu2 %vm235_vm0, %v3046_v50 }
  0xed   :  { %v1722_v54 = vadd.f32 %v3318_v2, %v1716_v21 }
  0xee   :  { %v298_v14 = vpop.f32.mrf.mxu0 }
  0xef   :  { %v550_v28 = vpop.f32.mrf.mxu2  ;;  %2189 = vmatmul.msk.f32.gmra.mxu1 %vm235_vm0, %v298_v14  ;;  %v1930_v14 = vadd.f32 %v1926_v43, %v1920_v19  ;;  %v1726_v62 = vadd.f32 3.0, %v1722_v54 }
  0xf0   :  { %2221 = vmatmul.msk.f32.gmra.mxu3 %vm235_vm0, %v550_v28  ;;  %v2510_v28 = vld [vmem:[#allocation2 + $0x70] sm:$0xff] }
  0xf1   :  { %2253 = vmatmul.msk.f32.gmra.mxu0 %vm235_vm0, %v3023_v56  ;;  %v1946_v12 = vmul.f32 %v2510_v28, %v3271_v9  ;;  %v1940_v22 = vadd.f32 %v1936_v52, %v1930_v14  ;;  %v1730_v58 = vmax.f32 %v1726_v62, 0.0  ;;  %v1701_v35 = vmul.f32 %v2510_v28, %v3300_v38  ;;  %v2513_v52 = vld [vmem:[#allocation2 + $0x8] sm:$0xff] }
  0xf2   :  { %v1919_v21 = vmul.f32 %v2513_v52, %v3260_v46  ;;  %v2514_v14 = vld [vmem:[#allocation2 + $0x28] sm:$0xff] }
  0xf3   :  { %v1950_v57 = vadd.f32 %v1946_v12, %v1940_v22  ;;  %v1925_v28 = vmul.f32 %v2514_v14, %v3262_v39  ;;  %v2515_v12 = vld [vmem:[#allocation2 + $0x48] sm:$0xff] }
  0xf4   :  { %2298 = vmatmul.msk.f32.gmra.mxu2 %vm235_vm0, %v3075_v59 }
  0xf5   :  { %v1929_v6 = vadd.f32 %v1925_v28, %v1919_v21 }
  0xf6   :  { %v301_v16 = vpop.f32.mrf.mxu0 }
  0xf7   :  { %v553_v0 = vpop.f32.mrf.mxu2  ;;  %2190 = vmatmul.msk.f32.gmra.mxu1 %vm235_vm0, %v301_v16  ;;  %v1734_v16 = vmin.f32 %v1730_v58, 6.0 }
  0xf8   :  { %2222 = vmatmul.msk.f32.gmra.mxu3 %vm235_vm0, %v553_v0 }
  0xf9   :  { %2254 = vmatmul.msk.f32.gmra.mxu0 %vm235_vm0, %v3030_v24  ;;  %v1738_v3 = vmul.f32 %v1734_v16, %v1722_v54  ;;  %v1935_v54 = vmul.f32 %v2515_v12, %v3264_v40 }
  0xfb   :  { %v1742_v63 = vmul.f32 0.16666667, %v1738_v3  ;;  %v1939_v62 = vadd.f32 %v1935_v54, %v1929_v6 }
  0xfc   :  { %2299 = vmatmul.msk.f32.gmra.mxu2 %vm235_vm0, %v3085_v31 }
  0xfd   :  { %1755 = vmatpush.msrb.mxu0 %v1742_v63 }
  0xfe   :  { %v304_v29 = vpop.f32.mrf.mxu0 }
  0xff   :  { %v556_v34 = vpop.f32.mrf.mxu2  ;;  %2191 = vmatmul.msk.f32.gmra.mxu1 %vm235_vm0, %v304_v29 }
 0x100   :  { %2223 = vmatmul.msk.f32.gmra.mxu3 %vm235_vm0, %v556_v34 }
 0x101   :  { %2255 = vmatmul.msk.f32.gmra.mxu0 %vm235_vm0, %v3046_v50 }
 0x104   :  { %2372 = vmatmul.msk.f32.vlgmr.msra.gmra.mxu2 %vm235_vm0, %v2889_v47  ;;  %v1960_v47 = vadd.f32 %v1956_v41, %v1950_v57  ;;  %v2516_v41 = vld [vmem:[#allocation2 + $0x68] sm:$0xff] }
 0x105   :  { %v2517_v57 = vld [vmem:[#allocation2 + $0x88] sm:$0xff] }
 0x106   :  { %v307_v60 = vpop.f32.mrf.mxu0  ;;  %v1966_v0 = vadd.f32 %v3285_v61, %v1960_v47  ;;  %v1955_v58 = vmul.f32 %v2517_v57, %v3276_v25 }
 0x107   :  { %v559_v42 = vpop.f32.mrf.mxu2  ;;  %2192 = vmatmul.msk.f32.gmra.mxu1 %vm235_vm0, %v307_v60  ;;  %v1945_v60 = vmul.f32 %v2516_v41, %v3271_v9 }
 0x108   :  { %2224 = vmatmul.msk.f32.gmra.mxu3 %vm235_vm0, %v559_v42  ;;  %v1970_v55 = vadd.f32 3.0, %v1966_v0 }
 0x109   :  { %2256 = vmatmul.msk.f32.gmra.mxu0 %vm235_vm0, %v3075_v59  ;;  %v1949_v3 = vadd.f32 %v1945_v60, %v1939_v62 }
 0x10a   :  { %v1974_v4 = vmax.f32 %v1970_v55, 0.0  ;;  %v3362_v55 = vld [vmem:[#allocation8 + $0x8] sm:$0xff] }
 0x10c   :  { %2373 = vmatmul.msk.f32.gmra.mxu2 %vm235_vm0, %v2927_v45  ;;  %v1978_v18 = vmin.f32 %v1974_v4, 6.0  ;;  %v1681_v45 = vmul.f32 %v2508_v20, %v3296_v7  ;;  %v3348_v20 = vld [vmem:[#allocation8] sm:$0xff] }
 0x10e   :  { %v310_v15 = vpop.f32.mrf.mxu0  ;;  %v1982_v29 = vmul.f32 %v1978_v18, %v1966_v0  ;;  %v1685_v34 = vadd.f32 %v1681_v45, %v1675_v32 }
 0x10f   :  { %v562_v1 = vpop.f32.mrf.mxu2  ;;  %2193 = vmatmul.msk.f32.gmra.mxu1 %vm235_vm0, %v310_v15 }
 0x110   :  { %2225 = vmatmul.msk.f32.gmra.mxu3 %vm235_vm0, %v562_v1  ;;  %v1986_v37 = vmul.f32 0.16666667, %v1982_v29  ;;  %v1695_v44 = vadd.f32 %v1691_v33, %v1685_v34  ;;  %v1959_v1 = vadd.f32 %v1955_v58, %v1949_v3  ;;  %v2523_v3 = vld [vmem:[#allocation2 + $0x80] sm:$0xff] }
 0x111   :  { %2257 = vmatmul.msk.f32.gmra.mxu0 %vm235_vm0, %v3085_v31 }
 0x112   :  { %v1705_v5 = vadd.f32 %v1701_v35, %v1695_v44  ;;  %2001 = vmatpush.msrb.mxu2 %v1986_v37  ;;  %v1965_v4 = vadd.f32 %v3285_v61, %v1959_v1  ;;  %v1674_v35 = vmul.f32 %v2513_v52, %v3294_v17  ;;  %v1680_v37 = vmul.f32 %v2514_v14, %v3296_v7 }
 0x113   :  { %v1690_v44 = vmul.f32 %v2515_v12, %v3298_v10 }
 0x114   :  { %2374 = vmatmul.msk.f32.gmra.mxu2 %vm235_vm0, %v2951_v48  ;;  %v1715_v26 = vadd.f32 %v1711_v11, %v1705_v5  ;;  %v1969_v32 = vadd.f32 3.0, %v1965_v4 }
 0x116   :  { %v313_v19 = vpop.f32.mrf.mxu0  ;;  %v1721_v22 = vadd.f32 %v3318_v2, %v1715_v26  ;;  %v1973_v29 = vmax.f32 %v1969_v32, 0.0  ;;  %v1710_v26 = vmul.f32 %v2517_v57, %v3309_v8  ;;  %v2521_v57 = vld [vmem:[#allocation2 + $0x40] sm:$0xff]  ;;  %v3424_v32 = vstv %s575_s4 }
 0x117   :  { %v565_v43 = vpop.f32.mrf.mxu2  ;;  %2194 = vmatmul.msk.f32.gmra.mxu1 %vm235_vm0, %v313_v19  ;;  %v1684_v19 = vadd.f32 %v1680_v37, %v1674_v35  ;;  %v1934_v58 = vmul.f32 %v2521_v57, %v3264_v40 }
 0x118   :  { %2226 = vmatmul.msk.f32.gmra.mxu3 %vm235_vm0, %v565_v43  ;;  %v1725_v42 = vadd.f32 3.0, %v1721_v22  ;;  %v1977_v34 = vmin.f32 %v1973_v29, 6.0  ;;  %v1700_v43 = vmul.f32 %v2516_v41, %v3300_v38  ;;  %v2519_v41 = vld [vmem:[#allocation2] sm:$0xff] }
 0x119   :  { %2330 = vmatmul.msk.f32.vlgmr.msra.gmra.mxu0 %vm235_vm0, %v3348_v20  ;;  %v1694_v5 = vadd.f32 %v1690_v44, %v1684_v19  ;;  %v1918_v60 = vmul.f32 %v2519_v41, %v3260_v46  ;;  %v3445_v19 = vstv %s329_s24 }
 0x11a   :  { %v1729_v0 = vmax.f32 %v1725_v42, 0.0  ;;  %v1981_v11 = vmul.f32 %v1977_v34, %v1965_v4  ;;  %v2520_v42 = vld [vmem:[#allocation2 + $0x20] sm:$0xff] }
 0x11b   :  { %v1704_v14 = vadd.f32 %v1700_v43, %v1694_v5  ;;  %v1924_v62 = vmul.f32 %v2520_v42, %v3262_v39  ;;  %v3451_v5 = vld [vmem:[#allocation8 + $0x38] sm:$0xff] }
 0x11c   :  { %2375 = vmatmul.msk.f32.gmra.mxu2 %vm235_vm0, %v2966_v23  ;;  %v1733_v15 = vmin.f32 %v1729_v0, 6.0 }
 0x11d   :  { %v1714_v28 = vadd.f32 %v1710_v26, %v1704_v14 }
 0x11e   :  { %v316_v47 = vpop.f32.mrf.mxu0  ;;  %v1737_v63 = vmul.f32 %v1733_v15, %v1721_v22  ;;  %v1954_v15 = vmul.f32 %v2523_v3, %v3276_v25 }
 0x11f   :  { %v568_v16 = vpop.f32.mrf.mxu2  ;;  %2195 = vmatmul.msk.f32.gmra.mxu1 %vm235_vm0, %v316_v47  ;;  %v1720_v12 = vadd.f32 %v3318_v2, %v1714_v28  ;;  %v1928_v47 = vadd.f32 %v1924_v62, %v1918_v60  ;;  %v3473_v62 = vld [vmem:[#allocation8 + $0x40] sm:$0xff] }
 0x120   :  { %2227 = vmatmul.msk.f32.gmra.mxu3 %vm235_vm0, %v568_v16  ;;  %v1741_v18 = vmul.f32 0.16666667, %v1737_v63  ;;  %v2522_v16 = vld [vmem:[#allocation2 + $0x60] sm:$0xff] }
 0x121   :  { %2331 = vmatmul.msk.f32.gmra.mxu0 %vm235_vm0, %v3362_v55  ;;  %v1724_v54 = vadd.f32 3.0, %v1720_v12  ;;  %v1944_v0 = vmul.f32 %v2522_v16, %v3271_v9  ;;  %v1938_v39 = vadd.f32 %v1934_v58, %v1928_v47 }
 0x122   :  { %1756 = vmatpush.msrb.mxu0 %v1741_v18  ;;  %v1699_v18 = vmul.f32 %v2522_v16, %v3300_v38  ;;  %v3481_v16 = vld [vmem:[#allocation11 + $0x18] sm:$0xff] }
 0x124   :  { %2376 = vmatmul.msk.f32.gmra.mxu2 %vm235_vm0, %v2983_v13 }
 0x126   :  { %v319_v45 = vpop.f32.mrf.mxu0 }
 0x127   :  { %v1025_v33 = vpop.f32.mrf.mxu2  ;;  %2196 = vmatmul.msk.f32.gmra.mxu1 %vm235_vm0, %v319_v45 }
 0x128   :  { %2300 = vmatmul.msk.f32.vlgmr.msrb.gmra.mxu3 %vm235_vm0, %v1025_v33 }
 0x129   :  { %2107 = vmatpush.msrb.mxu3 %v3133_v30  ;;  %2332 = vmatmul.msk.f32.gmra.mxu0 %vm235_vm0, %v2951_v48  ;;  %v1985_v48 = vmul.f32 0.16666667, %v1981_v11  ;;  %v3439_v11 = vld [vmem:[#allocation11 + $0x8] sm:$0xff] }
 0x12b   :  { %2108 = vmatpush.msrb.mxu3 %v3135_v49  ;;  %2002 = vmatpush.msrb.mxu2 %v1985_v48 }
 0x12c   :  { %2377 = vmatmul.msk.f32.gmra.mxu2 %vm235_vm0, %v2990_v51 }
 0x12d   :  { %2109 = vmatpush.msrb.mxu3 %v3142_v27 }
 0x12e   :  { %v322_v52 = vpop.f32.mrf.mxu0 }
 0x12f   :  { %v1028_v21 = vpop.f32.mrf.mxu2  ;;  %2110 = vmatpush.msrb.mxu3 %v3146_v36  ;;  %2197 = vmatmul.msk.f32.gmra.mxu1 %vm235_vm0, %v322_v52 }
 0x130   :  { %2301 = vmatmul.msk.f32.gmra.mxu3 %vm235_vm0, %v1028_v21 }
 0x131   :  { %2333 = vmatmul.msk.f32.gmra.mxu0 %vm235_vm0, %v2966_v23  ;;  %v1728_v23 = vmax.f32 %v1724_v54, 0.0  ;;  %v3459_v54 = vld [vmem:[#allocation11 + $0x10] sm:$0xff] }
 0x133   :  { %v1732_v46 = vmin.f32 %v1728_v23, 6.0  ;;  %v332_v23 = vmul.f32 %v3445_v19, %v3439_v11 }
 0x134   :  { %2378 = vmatmul.msk.f32.gmra.mxu2 %vm235_vm0, %v3006_v53 }
 0x135   :  { %v1736_v40 = vmul.f32 %v1732_v46, %v1720_v12 }
 0x136   :  { %v780_v22 = vpop.f32.mrf.mxu0 }
 0x137   :  { %v1031_v6 = vpop.f32.mrf.mxu2  ;;  %2258 = vmatmul.msk.f32.vlgmr.msrb.gmra.mxu1 %vm235_vm0, %v780_v22  ;;  %v1740_v9 = vmul.f32 0.16666667, %v1736_v40  ;;  %v333_v40 = vmul.f32 %v3445_v19, %v3459_v54 }
 0x138   :  { %2302 = vmatmul.msk.f32.gmra.mxu3 %vm235_vm0, %v1031_v6  ;;  %1862 = vmatpush.msrb.mxu1 %v3133_v30  ;;  %v1948_v30 = vadd.f32 %v1944_v0, %v1938_v39 }
 0x139   :  { %2334 = vmatmul.msk.f32.gmra.mxu0 %vm235_vm0, %v2983_v13 }
 0x13a   :  { %1863 = vmatpush.msrb.mxu1 %v3135_v49  ;;  %v1958_v13 = vadd.f32 %v1954_v15, %v1948_v30  ;;  %1757 = vmatpush.msrb.mxu0 %v1740_v9  ;;  %v1673_v49 = vmul.f32 %v2519_v41, %v3294_v17  ;;  %v1709_v17 = vmul.f32 %v2523_v3, %v3309_v8  ;;  %v3495_v15 = vld [vmem:[#allocation8 + $0x48] sm:$0xff] }
 0x13b   :  { %v580_v3 = vmul.f32 %v3424_v32, %v3481_v16 }
 0x13c   :  { %2379 = vmatmul.msk.f32.gmra.mxu2 %vm235_vm0, %v3023_v56  ;;  %1864 = vmatpush.msrb.mxu1 %v3142_v27  ;;  %v1964_v56 = vadd.f32 %v3285_v61, %v1958_v13  ;;  %v1679_v27 = vmul.f32 %v2520_v42, %v3296_v7  ;;  %v3426_v61 = vld [vmem:[#allocation11] sm:$0xff]  ;;  %v579_v42 = vmul.f32 %v3424_v32, %v3459_v54 }
 0x13d   :  { %v331_v26 = vmul.f32 %v3445_v19, %v3426_v61 }
 0x13e   :  { %v783_v1 = vpop.f32.mrf.mxu0  ;;  %1865 = vmatpush.msrb.mxu1 %v3146_v36  ;;  %v1689_v36 = vmul.f32 %v2521_v57, %v3298_v10  ;;  %v1968_v25 = vadd.f32 3.0, %v1964_v56  ;;  %v1683_v4 = vadd.f32 %v1679_v27, %v1673_v49 }
 0x13f   :  { %v1034_v63 = vpop.f32.mrf.mxu2  ;;  %2259 = vmatmul.msk.f32.gmra.mxu1 %vm235_vm0, %v783_v1 }
 0x140   :  { %2303 = vmatmul.msk.f32.gmra.mxu3 %vm235_vm0, %v1034_v63  ;;  %v1693_v45 = vadd.f32 %v1689_v36, %v1683_v4  ;;  %v3503_v63 = vld [vmem:[#allocation11 + $0x20] sm:$0xff]  ;;  %v334_v36 = vmul.f32 %v3445_v19, %v3481_v16 }
 0x141   :  { %2335 = vmatmul.msk.f32.gmra.mxu0 %vm235_vm0, %v2990_v51  ;;  %v1972_v51 = vmax.f32 %v1968_v25, 0.0  ;;  %v581_v27 = vmul.f32 %v3424_v32, %v3503_v63 }
 0x142   :  { %v1703_v38 = vadd.f32 %v1699_v18, %v1693_v45 }
 0x143   :  { %v1976_v33 = vmin.f32 %v1972_v51, 6.0  ;;  %v3523_v51 = vld [vmem:[#allocation11 + $0x28] sm:$0xff] }
 0x144   :  { %2380 = vmatmul.msk.f32.gmra.mxu2 %vm235_vm0, %v3030_v24  ;;  %v577_v24 = vmul.f32 %v3424_v32, %v3426_v61  ;;  %v1713_v34 = vadd.f32 %v1709_v17, %v1703_v38  ;;  %v2527_v38 = vld [vmem:[#allocation8 + $0x10] sm:$0xff] }
 0x145   :  { %v1980_v29 = vmul.f32 %v1976_v33, %v1964_v56 }
 0x146   :  { %v786_v7 = vpop.f32.mrf.mxu0  ;;  %v1719_v44 = vadd.f32 %v3318_v2, %v1713_v34  ;;  %v3542_v34 = vld [vmem:[#allocation11 + $0x30] sm:$0xff] }
 0x147   :  { %v1037_v10 = vpop.f32.mrf.mxu2  ;;  %2260 = vmatmul.msk.f32.gmra.mxu1 %vm235_vm0, %v786_v7  ;;  %v1984_v35 = vmul.f32 0.16666667, %v1980_v29 }
 0x148   :  { %2304 = vmatmul.msk.f32.gmra.mxu3 %vm235_vm0, %v1037_v10  ;;  %v335_v10 = vmul.f32 %v3445_v19, %v3503_v63 }
 0x149   :  { %2336 = vmatmul.msk.f32.gmra.mxu0 %vm235_vm0, %v3006_v53  ;;  %2003 = vmatpush.msrb.mxu2 %v1984_v35  ;;  %v1723_v53 = vadd.f32 3.0, %v1719_v44 }
 0x14b   :  { %v642_v8 = vpop.f32.mrf.mxu3  ;;  %v1727_v2 = vmax.f32 %v1723_v53, 0.0 }
 0x14c   :  { %v643_v37 = vadd.f32 %v642_v8, %v577_v24  ;;  %2381 = vmatmul.msk.f32.gmra.mxu2 %vm235_vm0, %v3046_v50  ;;  %v578_v50 = vmul.f32 %v3424_v32, %v3439_v11 }
 0x14d   :  { %v1731_v52 = vmin.f32 %v1727_v2, 6.0  ;;  %v3561_v2 = vld [vmem:[#allocation11 + $0x38] sm:$0xff] }
 0x14e   :  { %2228 = vst.msk [vmem:[%s4194_s6 + $0x60] sm:$0xff] %vm432_vm1, %v643_v37  ;;  %v789_v43 = vpop.f32.mrf.mxu0 }
 0x14f   :  { %v1040_v48 = vpop.f32.mrf.mxu2  ;;  %2261 = vmatmul.msk.f32.gmra.mxu1 %vm235_vm0, %v789_v43  ;;  %v1735_v28 = vmul.f32 %v1731_v52, %v1719_v44  ;;  %v336_v44 = vmul.f32 %v3445_v19, %v3523_v51 }
 0x150   :  { %2305 = vmatmul.msk.f32.gmra.mxu3 %vm235_vm0, %v1040_v48  ;;  %v2528_v48 = vld [vmem:[#allocation8 + $0x18] sm:$0xff] }
 0x151   :  { %2337 = vmatmul.msk.f32.gmra.mxu0 %vm235_vm0, %v3451_v5  ;;  %v1739_v6 = vmul.f32 0.16666667, %v1735_v28 }
 0x153   :  { %v645_v21 = vpop.f32.mrf.mxu3  ;;  %1758 = vmatpush.msrb.mxu0 %v1739_v6 }
 0x154   :  { %v646_v14 = vadd.f32 %v645_v21, %v578_v50  ;;  %2382 = vmatmul.msk.f32.gmra.mxu2 %vm235_vm0, %v3075_v59  ;;  %v396_v12 = vpop.f32.mrf.mxu1 }
 0x155   :  { %v397_v22 = vadd.f32 %v396_v12, %v331_v26 }
 0x156   :  { %2229 = vst.msk [vmem:[%s4194_s6 + $0x68] sm:$0xff] %vm432_vm1, %v646_v14  ;;  %v792_v41 = vpop.f32.mrf.mxu0  ;;  %v337_v14 = vmul.f32 %v3445_v19, %v3542_v34 }
 0x157   :  { %v1043_v60 = vpop.f32.mrf.mxu2  ;;  %433 = vst.msk [vmem:[%s4194_s6] sm:$0xff] %vm432_vm1, %v397_v22  ;;  %2262 = vmatmul.msk.f32.gmra.mxu1 %vm235_vm0, %v792_v41  ;;  %v2529_v22 = vld [vmem:[#allocation8 + $0x20] sm:$0xff] }
 0x158   :  { %2306 = vmatmul.msk.f32.gmra.mxu3 %vm235_vm0, %v1043_v60  ;;  %v3580_v41 = vld [vmem:[#allocation11 + $0x40] sm:$0xff] }
 0x159   :  { %2338 = vmatmul.msk.f32.gmra.mxu0 %vm235_vm0, %v3473_v62 }
 0x15b   :  { %v648_v57 = vpop.f32.mrf.mxu3 }
 0x15c   :  { %v649_v58 = vadd.f32 %v648_v57, %v579_v42  ;;  %2383 = vmatmul.msk.f32.gmra.mxu2 %vm235_vm0, %v3085_v31  ;;  %v399_v47 = vpop.f32.mrf.mxu1  ;;  %v338_v57 = vmul.f32 %v3445_v19, %v3561_v2 }
 0x15d   :  { %v400_v0 = vadd.f32 %v399_v47, %v332_v23 }
 0x15e   :  { %2230 = vst.msk [vmem:[%s4194_s6 + $0x70] sm:$0xff] %vm432_vm1, %v649_v58  ;;  %v795_v46 = vpop.f32.mrf.mxu0 }
 0x15f   :  { %v1046_v39 = vpop.f32.mrf.mxu2  ;;  %434 = vst.msk [vmem:[%s4194_s6 + $0x8] sm:$0xff] %vm432_vm1, %v400_v0  ;;  %2263 = vmatmul.msk.f32.gmra.mxu1 %vm235_vm0, %v795_v46  ;;  %v2530_v0 = vld [vmem:[#allocation8 + $0x28] sm:$0xff] }
 0x160   :  { %2307 = vmatmul.msk.f32.gmra.mxu3 %vm235_vm0, %v1046_v39  ;;  %v3598_v39 = vld [vmem:[#allocation11 + $0x48] sm:$0xff] }
 0x161   :  { %2339 = vmatmul.msk.f32.gmra.mxu0 %vm235_vm0, %v3495_v15 }
 0x163   :  { %v651_v30 = vpop.f32.mrf.mxu3 }
 0x164   :  { %v652_v9 = vadd.f32 %v651_v30, %v580_v3  ;;  %2456 = vmatmul.msk.f32.vlgmr.msrb.gmra.mxu2 %vm235_vm0, %v3348_v20  ;;  %v402_v1 = vpop.f32.mrf.mxu1 }
 0x165   :  { %v403_v13 = vadd.f32 %v402_v1, %v333_v40  ;;  %v339_v1 = vmul.f32 %v3445_v19, %v3580_v41 }
 0x166   :  { %2231 = vst.msk [vmem:[%s4194_s6 + $0x78] sm:$0xff] %vm432_vm1, %v652_v9  ;;  %v798_v56 = vpop.f32.mrf.mxu0  ;;  %v586_v9 = vmul.f32 %v3424_v32, %v3598_v39 }
 0x167   :  { %v1049_v49 = vpop.f32.mrf.mxu2  ;;  %435 = vst.msk [vmem:[%s4194_s6 + $0x10] sm:$0xff] %vm432_vm1, %v403_v13  ;;  %2264 = vmatmul.msk.f32.gmra.mxu1 %vm235_vm0, %v798_v56 }
 0x168   :  { %2308 = vmatmul.msk.f32.gmra.mxu3 %vm235_vm0, %v1049_v49  ;;  %v2531_v49 = vld [vmem:[#allocation8 + $0x30] sm:$0xff] }
 0x169   :  { %2340 = vmatmul.msk.f32.gmra.mxu0 %vm235_vm0, %v3075_v59  ;;  %v582_v59 = vmul.f32 %v3424_v32, %v3523_v51 }
 0x16b   :  { %v654_v25 = vpop.f32.mrf.mxu3 }
 0x16c   :  { %v655_v4 = vadd.f32 %v654_v25, %v581_v27  ;;  %2457 = vmatmul.msk.f32.gmra.mxu2 %vm235_vm0, %v3362_v55  ;;  %v405_v18 = vpop.f32.mrf.mxu1 }
 0x16d   :  { %v406_v45 = vadd.f32 %v405_v18, %v334_v36  ;;  %v3617_v36 = vld [vmem:[#allocation11 + $0x50] sm:$0xff] }
 0x16e   :  { %2232 = vst.msk [vmem:[%s4194_s6 + $0x80] sm:$0xff] %vm432_vm1, %v655_v4  ;;  %v801_v17 = vpop.f32.mrf.mxu0 }
 0x16f   :  { %v1052_v7 = vpop.f32.mrf.mxu2  ;;  %436 = vst.msk [vmem:[%s4194_s6 + $0x18] sm:$0xff] %vm432_vm1, %v406_v45  ;;  %2265 = vmatmul.msk.f32.gmra.mxu1 %vm235_vm0, %v801_v17  ;;  %v587_v45 = vmul.f32 %v3424_v32, %v3617_v36  ;;  %v340_v17 = vmul.f32 %v3445_v19, %v3598_v39 }
 0x170   :  { %2309 = vmatmul.msk.f32.gmra.mxu3 %vm235_vm0, %v1052_v7 }
 0x171   :  { %2341 = vmatmul.msk.f32.gmra.mxu0 %vm235_vm0, %v3085_v31  ;;  %v583_v31 = vmul.f32 %v3424_v32, %v3542_v34 }
 0x173   :  { %v657_v33 = vpop.f32.mrf.mxu3 }
 0x174   :  { %v658_v24 = vadd.f32 %v657_v33, %v582_v59  ;;  %2458 = vmatmul.msk.f32.gmra.mxu2 %vm235_vm0, %v2527_v38  ;;  %v408_v29 = vpop.f32.mrf.mxu1  ;;  %v3640_v33 = vld [vmem:[#allocation11 + $0x58] sm:$0x7f] }
 0x175   :  { %v409_v8 = vadd.f32 %v408_v29, %v335_v10 }
 0x176   :  { %2233 = vst.msk [vmem:[%s4194_s6 + $0x88] sm:$0xff] %vm432_vm1, %v658_v24  ;;  %v804_v35 = vpop.f32.mrf.mxu0 }
 0x177   :  { %v1055_v37 = vpop.f32.mrf.mxu2  ;;  %437 = vst.msk [vmem:[%s4194_s6 + $0x20] sm:$0xff] %vm432_vm1, %v409_v8  ;;  %2266 = vmatmul.msk.f32.gmra.mxu1 %vm235_vm0, %v804_v35  ;;  %v588_v8 = vmul.f32 %v3424_v32, %v3640_v33  ;;  %v341_v35 = vmul.f32 %v3445_v19, %v3617_v36 }
 0x178   :  { %2310 = vmatmul.msk.f32.gmra.mxu3 %vm235_vm0, %v1055_v37 }
 0x179   :  { %2414 = vmatmul.msk.f32.vlgmr.msrb.gmra.mxu0 %vm235_vm0, %v3348_v20  ;;  %v584_v20 = vmul.f32 %v3424_v32, %v3561_v2 }
 0x17b   :  { %v660_v53 = vpop.f32.mrf.mxu3 }
 0x17c   :  { %v661_v43 = vadd.f32 %v660_v53, %v583_v31  ;;  %2459 = vmatmul.msk.f32.gmra.mxu2 %vm235_vm0, %v2528_v48  ;;  %v411_v50 = vpop.f32.mrf.mxu1 }
 0x17d   :  { %v412_v26 = vadd.f32 %v411_v50, %v336_v44  ;;  %v3661_v44 = vstv %s1065_s8  ;;  %s1552_s8 = smax.f32 %s2674_s17, %s1551_s12 }
 0x17e   :  { %2234 = vst.msk [vmem:[%s4194_s6 + $0x90] sm:$0xff] %vm432_vm1, %v661_v43  ;;  %v807_v52 = vpop.f32.mrf.mxu0  ;;  %v1067_v50 = vmul.f32 %v3661_v44, %v3426_v61  ;;  %s1553_s7 = smin.f32 %s2675_s19, %s1552_s8 }
 0x17f   :  { %v1058_v21 = vpop.f32.mrf.mxu2  ;;  %438 = vst.msk [vmem:[%s4194_s6 + $0x28] sm:$0xff] %vm432_vm1, %v412_v26  ;;  %2267 = vmatmul.msk.f32.gmra.mxu1 %vm235_vm0, %v807_v52  ;;  %v342_v26 = vmul.f32 %v3445_v19, %v3640_v33  ;;  %v1068_v19 = vmul.f32 %v3661_v44, %v3439_v11  ;;  %s1554_s3 = smul.f32 %s3056_s22, %s1553_s7  ;;  %s1307_s22 = smax.f32 %s2674_s17, %s1306_s9 }
 0x180   :  { %2311 = vmatmul.msk.f32.gmra.mxu3 %vm235_vm0, %v1058_v21  ;;  %s1308_s16 = smin.f32 %s2675_s19, %s1307_s22  ;;  %s2041_s7 = sadd.f32 3.0, %s3266_s10 }
 0x181   :  { %2415 = vmatmul.msk.f32.gmra.mxu0 %vm235_vm0, %v3362_v55  ;;  %v585_v55 = vmul.f32 %v3424_v32, %v3580_v41  ;;  %s1555_s14 = smul.f32 0.16666667, %s1554_s3  ;;  %s1796_s22 = sadd.f32 3.0, %s3302_s15 }
 0x182   :  { %s1309_s21 = smul.f32 %s3097_s27, %s1308_s16  ;;  %s2042_s0 = smax.f32 %s2674_s17, %s2041_s7 }
 0x183   :  { %v663_v28 = vpop.f32.mrf.mxu3  ;;  %s2043_s13 = smin.f32 %s2675_s19, %s2042_s0  ;;  %s1797_s2 = smax.f32 %s2674_s17, %s1796_s22 }
 0x184   :  { %v664_v12 = vadd.f32 %v663_v28, %v584_v20  ;;  %2460 = vmatmul.msk.f32.gmra.mxu2 %vm235_vm0, %v2529_v22  ;;  %v414_v6 = vpop.f32.mrf.mxu1  ;;  %v3685_v28 = vstv %s820_s1  ;;  %s1310_s5 = smul.f32 0.16666667, %s1309_s21 }
 0x185   :  { %v415_v60 = vadd.f32 %v414_v6, %v337_v14  ;;  %v822_v6 = vmul.f32 %v3685_v28, %v3426_v61 }
 0x186   :  { %2235 = vst.msk [vmem:[%s4194_s6 + $0x98] sm:$0xff] %vm432_vm1, %v664_v12  ;;  %v810_v42 = vpop.f32.mrf.mxu0 }
 0x187   :  { %v1515_v23 = vpop.f32.mrf.mxu2  ;;  %439 = vst.msk [vmem:[%s4194_s6 + $0x30] sm:$0xff] %vm432_vm1, %v415_v60  ;;  %2268 = vmatmul.msk.f32.gmra.mxu1 %vm235_vm0, %v810_v42 }
 0x188   :  { %2384 = vmatmul.msk.f32.vlgmr.msra.gmra.mxu3 %vm235_vm0, %v1515_v23  ;;  %v2532_v23 = vld [vmem:[#allocation8 + $0x50] sm:$0xff] }
 0x189   :  { %2416 = vmatmul.msk.f32.gmra.mxu0 %vm235_vm0, %v2527_v38 }
 0x18b   :  { %v666_v58 = vpop.f32.mrf.mxu3 }
 0x18c   :  { %v667_v47 = vadd.f32 %v666_v58, %v585_v55  ;;  %2461 = vmatmul.msk.f32.gmra.mxu2 %vm235_vm0, %v2530_v0  ;;  %v417_v46 = vpop.f32.mrf.mxu1 }
 0x18d   :  { %v418_v3 = vadd.f32 %v417_v46, %v338_v57 }
 0x18e   :  { %2236 = vst.msk [vmem:[%s4194_s6 + $0xa0] sm:$0xff] %vm432_vm1, %v667_v47  ;;  %v813_v40 = vpop.f32.mrf.mxu0 }
 0x18f   :  { %v1518_v30 = vpop.f32.mrf.mxu2  ;;  %440 = vst.msk [vmem:[%s4194_s6 + $0x38] sm:$0xff] %vm432_vm1, %v418_v3  ;;  %2269 = vmatmul.msk.f32.gmra.mxu1 %vm235_vm0, %v813_v40  ;;  %v2533_v40 = vld [vmem:[#allocation8 + $0x58] sm:$0x7f] }
 0x190   :  { %2385 = vmatmul.msk.f32.gmra.mxu3 %vm235_vm0, %v1518_v30 }
 0x191   :  { %2417 = vmatmul.msk.f32.gmra.mxu0 %vm235_vm0, %v2528_v48 }
 0x193   :  { %v669_v13 = vpop.f32.mrf.mxu3 }
 0x194   :  { %v670_v56 = vadd.f32 %v669_v13, %v586_v9  ;;  %2462 = vmatmul.msk.f32.gmra.mxu2 %vm235_vm0, %v2531_v49  ;;  %v420_v27 = vpop.f32.mrf.mxu1 }
 0x195   :  { %v421_v25 = vadd.f32 %v420_v27, %v339_v1 }
 0x196   :  { %2237 = vst.msk [vmem:[%s4194_s6 + $0xa8] sm:$0xff] %vm432_vm1, %v670_v56  ;;  %v1270_v4 = vpop.f32.mrf.mxu0  ;;  %v824_v56 = vmul.f32 %v3685_v28, %v3459_v54 }
 0x197   :  { %v1521_v18 = vpop.f32.mrf.mxu2  ;;  %441 = vst.msk [vmem:[%s4194_s6 + $0x40] sm:$0xff] %vm432_vm1, %v421_v25  ;;  %2342 = vmatmul.msk.f32.vlgmr.msra.gmra.mxu1 %vm235_vm0, %v1270_v4 }
 0x198   :  { %2386 = vmatmul.msk.f32.gmra.mxu3 %vm235_vm0, %v1521_v18 }
 0x199   :  { %2418 = vmatmul.msk.f32.gmra.mxu0 %vm235_vm0, %v2529_v22 }
 0x19b   :  { %v672_v7 = vpop.f32.mrf.mxu3 }
 0x19c   :  { %v673_v59 = vadd.f32 %v672_v7, %v587_v45  ;;  %2463 = vmatmul.msk.f32.gmra.mxu2 %vm235_vm0, %v3451_v5  ;;  %v423_v10 = vpop.f32.mrf.mxu1 }
 0x19d   :  { %v424_v24 = vadd.f32 %v423_v10, %v340_v17  ;;  %v825_v17 = vmul.f32 %v3685_v28, %v3481_v16 }
 0x19e   :  { %2238 = vst.msk [vmem:[%s4194_s6 + $0xb0] sm:$0xff] %vm432_vm1, %v673_v59  ;;  %v1273_v38 = vpop.f32.mrf.mxu0 }
 0x19f   :  { %v1524_v29 = vpop.f32.mrf.mxu2  ;;  %442 = vst.msk [vmem:[%s4194_s6 + $0x48] sm:$0xff] %vm432_vm1, %v424_v24  ;;  %2343 = vmatmul.msk.f32.gmra.mxu1 %vm235_vm0, %v1273_v38 }
 0x1a0   :  { %2387 = vmatmul.msk.f32.gmra.mxu3 %vm235_vm0, %v1524_v29 }
 0x1a1   :  { %2419 = vmatmul.msk.f32.gmra.mxu0 %vm235_vm0, %v2530_v0  ;;  %v823_v0 = vmul.f32 %v3685_v28, %v3439_v11 }
 0x1a3   :  { %v675_v37 = vpop.f32.mrf.mxu3 }
 0x1a4   :  { %v676_v31 = vadd.f32 %v675_v37, %v588_v8  ;;  %2464 = vmatmul.msk.f32.gmra.mxu2 %vm235_vm0, %v3473_v62  ;;  %v426_v53 = vpop.f32.mrf.mxu1  ;;  %v1072_v8 = vmul.f32 %v3661_v44, %v3523_v51 }
 0x1a5   :  { %v427_v32 = vadd.f32 %v426_v53, %v341_v35  ;;  %v826_v35 = vmul.f32 %v3685_v28, %v3503_v63 }
 0x1a6   :  { %2239 = vst.msk [vmem:[%s4194_s6 + $0xb8] sm:$0x7f] %vm444_vm2, %v676_v31  ;;  %v1276_v43 = vpop.f32.mrf.mxu0 }
 0x1a7   :  { %v1527_v48 = vpop.f32.mrf.mxu2  ;;  %443 = vst.msk [vmem:[%s4194_s6 + $0x50] sm:$0xff] %vm432_vm1, %v427_v32  ;;  %2344 = vmatmul.msk.f32.gmra.mxu1 %vm235_vm0, %v1276_v43 }
 0x1a8   :  { %2388 = vmatmul.msk.f32.gmra.mxu3 %vm235_vm0, %v1527_v48 }
 0x1a9   :  { %2420 = vmatmul.msk.f32.gmra.mxu0 %vm235_vm0, %v2531_v49 }
 0x1ab   :  { %v1132_v52 = vpop.f32.mrf.mxu3 }
 0x1ac   :  { %v1133_v21 = vadd.f32 %v1132_v52, %v1067_v50  ;;  %2465 = vmatmul.msk.f32.gmra.mxu2 %vm235_vm0, %v3495_v15  ;;  %v429_v20 = vpop.f32.mrf.mxu1  ;;  %v1073_v50 = vmul.f32 %v3661_v44, %v3542_v34 }
 0x1ad   :  { %v430_v14 = vadd.f32 %v429_v20, %v342_v26  ;;  %v827_v26 = vmul.f32 %v3685_v28, %v3523_v51 }
 0x1ae   :  { %2312 = vst.msk [vmem:[%s4194_s6 + $0x120] sm:$0xff] %vm432_vm1, %v1133_v21  ;;  %v1279_v12 = vpop.f32.mrf.mxu0 }
 0x1af   :  { %v1530_v22 = vpop.f32.mrf.mxu2  ;;  %445 = vst.msk [vmem:[%s4194_s6 + $0x58] sm:$0x7f] %vm444_vm2, %v430_v14  ;;  %2345 = vmatmul.msk.f32.gmra.mxu1 %vm235_vm0, %v1279_v12 }
 0x1b0   :  { %2389 = vmatmul.msk.f32.gmra.mxu3 %vm235_vm0, %v1530_v22 }
 0x1b1   :  { %2421 = vmatmul.msk.f32.gmra.mxu0 %vm235_vm0, %v3451_v5  ;;  %v1069_v5 = vmul.f32 %v3661_v44, %v3459_v54 }
 0x1b3   :  { %v1135_v60 = vpop.f32.mrf.mxu3 }
 0x1b4   :  { %v1136_v42 = vadd.f32 %v1135_v60, %v1068_v19  ;;  %2466 = vmatmul.msk.f32.gmra.mxu2 %vm235_vm0, %v2532_v23  ;;  %v887_v55 = vpop.f32.mrf.mxu1  ;;  %v1074_v19 = vmul.f32 %v3661_v44, %v3561_v2 }
 0x1b5   :  { %v888_v57 = vadd.f32 %v887_v55, %v822_v6  ;;  %v828_v6 = vmul.f32 %v3685_v28, %v3542_v34 }
 0x1b6   :  { %2313 = vst.msk [vmem:[%s4194_s6 + $0x128] sm:$0xff] %vm432_vm1, %v1136_v42  ;;  %v1282_v58 = vpop.f32.mrf.mxu0 }
 0x1b7   :  { %v1533_v47 = vpop.f32.mrf.mxu2  ;;  %2270 = vst.msk [vmem:[%s4194_s6 + $0xc0] sm:$0xff] %vm432_vm1, %v888_v57  ;;  %2346 = vmatmul.msk.f32.gmra.mxu1 %vm235_vm0, %v1282_v58 }
 0x1b8   :  { %2390 = vmatmul.msk.f32.gmra.mxu3 %vm235_vm0, %v1533_v47  ;;  %v1075_v47 = vmul.f32 %v3661_v44, %v3580_v41 }
 0x1b9   :  { %2422 = vmatmul.msk.f32.gmra.mxu0 %vm235_vm0, %v3473_v62  ;;  %v1070_v62 = vmul.f32 %v3661_v44, %v3481_v16 }
 0x1bb   :  { %v1138_v46 = vpop.f32.mrf.mxu3 }
 0x1bc   :  { %v1139_v3 = vadd.f32 %v1138_v46, %v1069_v5  ;;  %2467 = vmatmul.msk.f32.gmra.mxu2 %vm235_vm0, %v2533_v40  ;;  %v890_v30 = vpop.f32.mrf.mxu1  ;;  %v829_v5 = vmul.f32 %v3685_v28, %v3561_v2 }
 0x1bd   :  { %v891_v9 = vadd.f32 %v890_v30, %v823_v0 }
 0x1be   :  { %2314 = vst.msk [vmem:[%s4194_s6 + $0x130] sm:$0xff] %vm432_vm1, %v1139_v3  ;;  %v1285_v1 = vpop.f32.mrf.mxu0 }
 0x1bf   :  { %v1536_v13 = vpop.f32.mrf.mxu2  ;;  %2271 = vst.msk [vmem:[%s4194_s6 + $0xc8] sm:$0xff] %vm432_vm1, %v891_v9  ;;  %2347 = vmatmul.msk.f32.gmra.mxu1 %vm235_vm0, %v1285_v1  ;;  %v1076_v1 = vmul.f32 %v3661_v44, %v3598_v39 }
 0x1c0   :  { %2391 = vmatmul.msk.f32.gmra.mxu3 %vm235_vm0, %v1536_v13  ;;  %v830_v13 = vmul.f32 %v3685_v28, %v3580_v41 }
 0x1c1   :  { %2423 = vmatmul.msk.f32.gmra.mxu0 %vm235_vm0, %v3495_v15  ;;  %v1071_v15 = vmul.f32 %v3661_v44, %v3503_v63 }
 0x1c3   :  { %v1141_v49 = vpop.f32.mrf.mxu3 }
 0x1c4   :  { %v1142_v27 = vadd.f32 %v1141_v49, %v1070_v62  ;;  %v893_v25 = vpop.f32.mrf.mxu1 }
 0x1c5   :  { %v894_v4 = vadd.f32 %v893_v25, %v824_v56 }
 0x1c6   :  { %2315 = vst.msk [vmem:[%s4194_s6 + $0x138] sm:$0xff] %vm432_vm1, %v1142_v27  ;;  %v1288_v18 = vpop.f32.mrf.mxu0 }
 0x1c7   :  { %v1539_v45 = vpop.f32.mrf.mxu2  ;;  %2272 = vst.msk [vmem:[%s4194_s6 + $0xd0] sm:$0xff] %vm432_vm1, %v894_v4  ;;  %2348 = vmatmul.msk.f32.gmra.mxu1 %vm235_vm0, %v1288_v18  ;;  %v1077_v18 = vmul.f32 %v3661_v44, %v3617_v36 }
 0x1c8   :  { %2392 = vmatmul.msk.f32.gmra.mxu3 %vm235_vm0, %v1539_v45  ;;  %v831_v45 = vmul.f32 %v3685_v28, %v3598_v39 }
 0x1c9   :  { %2424 = vmatmul.msk.f32.gmra.mxu0 %vm235_vm0, %v2532_v23 }
 0x1cb   :  { %v1144_v7 = vpop.f32.mrf.mxu3 }
 0x1cc   :  { %v1145_v59 = vadd.f32 %v1144_v7, %v1071_v15  ;;  %v896_v10 = vpop.f32.mrf.mxu1 }
 0x1cd   :  { %v897_v24 = vadd.f32 %v896_v10, %v825_v17 }
 0x1ce   :  { %2316 = vst.msk [vmem:[%s4194_s6 + $0x140] sm:$0xff] %vm432_vm1, %v1145_v59  ;;  %v1291_v38 = vpop.f32.mrf.mxu0 }
 0x1cf   :  { %v1542_v29 = vpop.f32.mrf.mxu2  ;;  %2273 = vst.msk [vmem:[%s4194_s6 + $0xd8] sm:$0xff] %vm432_vm1, %v897_v24  ;;  %2349 = vmatmul.msk.f32.gmra.mxu1 %vm235_vm0, %v1291_v38  ;;  %v1078_v38 = vmul.f32 %v3661_v44, %v3640_v33 }
 0x1d0   :  { %2393 = vmatmul.msk.f32.gmra.mxu3 %vm235_vm0, %v1542_v29  ;;  %v832_v29 = vmul.f32 %v3685_v28, %v3617_v36 }
 0x1d1   :  { %2425 = vmatmul.msk.f32.gmra.mxu0 %vm235_vm0, %v2533_v40 }
 0x1d3   :  { %v1147_v37 = vpop.f32.mrf.mxu3 }
 0x1d4   :  { %v1148_v31 = vadd.f32 %v1147_v37, %v1072_v8  ;;  %v899_v53 = vpop.f32.mrf.mxu1 }
 0x1d5   :  { %v900_v32 = vadd.f32 %v899_v53, %v826_v35 }
 0x1d6   :  { %2317 = vst.msk [vmem:[%s4194_s6 + $0x148] sm:$0xff] %vm432_vm1, %v1148_v31  ;;  %v1294_v43 = vpop.f32.mrf.mxu0  ;;  %v3854_v31 = vstv %s1555_s14  ;;  %s2044_s14 = smul.f32 %s3266_s10, %s2043_s13  ;;  %s1798_s10 = smin.f32 %s2675_s19, %s1797_s2 }
 0x1d7   :  { %v1545_v48 = vpop.f32.mrf.mxu2  ;;  %2274 = vst.msk [vmem:[%s4194_s6 + $0xe0] sm:$0xff] %vm432_vm1, %v900_v32  ;;  %2350 = vmatmul.msk.f32.gmra.mxu1 %vm235_vm0, %v1294_v43  ;;  %v1557_v43 = vmul.f32 %v3854_v31, %v3426_v61  ;;  %s1799_s26 = smul.f32 %s3302_s15, %s1798_s10 }
 0x1d8   :  { %2394 = vmatmul.msk.f32.gmra.mxu3 %vm235_vm0, %v1545_v48  ;;  %v833_v48 = vmul.f32 %v3685_v28, %v3640_v33  ;;  %v1558_v28 = vmul.f32 %v3854_v31, %v3439_v11  ;;  %s2045_s4 = smul.f32 0.16666667, %s2044_s14 }
 0x1d9   :  { %s1800_s19 = smul.f32 0.16666667, %s1799_s26 }
 0x1db   :  { %v1150_v52 = vpop.f32.mrf.mxu3 }
 0x1dc   :  { %v1151_v21 = vadd.f32 %v1150_v52, %v1073_v50  ;;  %v902_v20 = vpop.f32.mrf.mxu1 }
 0x1dd   :  { %v903_v14 = vadd.f32 %v902_v20, %v827_v26 }
 0x1de   :  { %2318 = vst.msk [vmem:[%s4194_s6 + $0x150] sm:$0xff] %vm432_vm1, %v1151_v21  ;;  %v1297_v12 = vpop.f32.mrf.mxu0 }
 0x1df   :  { %v1548_v22 = vpop.f32.mrf.mxu2  ;;  %2275 = vst.msk [vmem:[%s4194_s6 + $0xe8] sm:$0xff] %vm432_vm1, %v903_v14  ;;  %2351 = vmatmul.msk.f32.gmra.mxu1 %vm235_vm0, %v1297_v12  ;;  %v3875_v14 = vstv %s1310_s5 }
 0x1e0   :  { %2395 = vmatmul.msk.f32.gmra.mxu3 %vm235_vm0, %v1548_v22  ;;  %v1312_v22 = vmul.f32 %v3875_v14, %v3426_v61  ;;  %v1559_v61 = vmul.f32 %v3854_v31, %v3459_v54 }
 0x1e3   :  { %v1153_v60 = vpop.f32.mrf.mxu3 }
 0x1e4   :  { %v1154_v42 = vadd.f32 %v1153_v60, %v1074_v19  ;;  %v905_v23 = vpop.f32.mrf.mxu1 }
 0x1e5   :  { %v906_v55 = vadd.f32 %v905_v23, %v828_v6 }
 0x1e6   :  { %2319 = vst.msk [vmem:[%s4194_s6 + $0x158] sm:$0xff] %vm432_vm1, %v1154_v42  ;;  %v1300_v57 = vpop.f32.mrf.mxu0 }
 0x1e7   :  { %v2005_v58 = vpop.f32.mrf.mxu2  ;;  %2276 = vst.msk [vmem:[%s4194_s6 + $0xf0] sm:$0xff] %vm432_vm1, %v906_v55  ;;  %2352 = vmatmul.msk.f32.gmra.mxu1 %vm235_vm0, %v1300_v57  ;;  %v1313_v57 = vmul.f32 %v3875_v14, %v3439_v11 }
 0x1e8   :  { %2468 = vmatmul.msk.f32.vlgmr.msrb.gmra.mxu3 %vm235_vm0, %v2005_v58 }
 0x1eb   :  { %v1156_v0 = vpop.f32.mrf.mxu3 }
 0x1ec   :  { %v1157_v46 = vadd.f32 %v1156_v0, %v1075_v47  ;;  %v908_v3 = vpop.f32.mrf.mxu1 }
 0x1ed   :  { %v909_v40 = vadd.f32 %v908_v3, %v829_v5 }
 0x1ee   :  { %2320 = vst.msk [vmem:[%s4194_s6 + $0x160] sm:$0xff] %vm432_vm1, %v1157_v46  ;;  %v1303_v30 = vpop.f32.mrf.mxu0 }
 0x1ef   :  { %v2008_v9 = vpop.f32.mrf.mxu2  ;;  %2277 = vst.msk [vmem:[%s4194_s6 + $0xf8] sm:$0xff] %vm432_vm1, %v909_v40  ;;  %2353 = vmatmul.msk.f32.gmra.mxu1 %vm235_vm0, %v1303_v30  ;;  %v1560_v40 = vmul.f32 %v3854_v31, %v3481_v16  ;;  %v1314_v30 = vmul.f32 %v3875_v14, %v3459_v54 }
 0x1f0   :  { %2469 = vmatmul.msk.f32.gmra.mxu3 %vm235_vm0, %v2008_v9 }
 0x1f3   :  { %v1159_v62 = vpop.f32.mrf.mxu3 }
 0x1f4   :  { %v1160_v56 = vadd.f32 %v1159_v62, %v1076_v1  ;;  %v911_v49 = vpop.f32.mrf.mxu1 }
 0x1f5   :  { %v912_v27 = vadd.f32 %v911_v49, %v830_v13 }
 0x1f6   :  { %2321 = vst.msk [vmem:[%s4194_s6 + $0x168] sm:$0xff] %vm432_vm1, %v1160_v56  ;;  %v1760_v25 = vpop.f32.mrf.mxu0 }
 0x1f7   :  { %v2011_v4 = vpop.f32.mrf.mxu2  ;;  %2278 = vst.msk [vmem:[%s4194_s6 + $0x100] sm:$0xff] %vm432_vm1, %v912_v27  ;;  %2426 = vmatmul.msk.f32.vlgmr.msrb.gmra.mxu1 %vm235_vm0, %v1760_v25  ;;  %v1561_v27 = vmul.f32 %v3854_v31, %v3503_v63  ;;  %v1315_v25 = vmul.f32 %v3875_v14, %v3481_v16 }
 0x1f8   :  { %2470 = vmatmul.msk.f32.gmra.mxu3 %vm235_vm0, %v2011_v4 }
 0x1fb   :  { %v1162_v15 = vpop.f32.mrf.mxu3 }
 0x1fc   :  { %v1163_v17 = vadd.f32 %v1162_v15, %v1077_v18  ;;  %v914_v7 = vpop.f32.mrf.mxu1 }
 0x1fd   :  { %v915_v59 = vadd.f32 %v914_v7, %v831_v45 }
 0x1fe   :  { %2322 = vst.msk [vmem:[%s4194_s6 + $0x170] sm:$0xff] %vm432_vm1, %v1163_v17  ;;  %v1763_v10 = vpop.f32.mrf.mxu0 }
 0x1ff   :  { %v2014_v24 = vpop.f32.mrf.mxu2  ;;  %2279 = vst.msk [vmem:[%s4194_s6 + $0x108] sm:$0xff] %vm432_vm1, %v915_v59  ;;  %2427 = vmatmul.msk.f32.gmra.mxu1 %vm235_vm0, %v1763_v10  ;;  %v1562_v59 = vmul.f32 %v3854_v31, %v3523_v51  ;;  %v1316_v10 = vmul.f32 %v3875_v14, %v3503_v63 }
 0x200   :  { %2471 = vmatmul.msk.f32.gmra.mxu3 %vm235_vm0, %v2014_v24 }
 0x203   :  { %v1165_v8 = vpop.f32.mrf.mxu3 }
 0x204   :  { %v1166_v35 = vadd.f32 %v1165_v8, %v1078_v38  ;;  %v917_v37 = vpop.f32.mrf.mxu1 }
 0x205   :  { %v918_v53 = vadd.f32 %v917_v37, %v832_v29 }
 0x206   :  { %2323 = vst.msk [vmem:[%s4194_s6 + $0x178] sm:$0x7f] %vm444_vm2, %v1166_v35  ;;  %v1766_v44 = vpop.f32.mrf.mxu0 }
 0x207   :  { %v2017_v32 = vpop.f32.mrf.mxu2  ;;  %2280 = vst.msk [vmem:[%s4194_s6 + $0x110] sm:$0xff] %vm432_vm1, %v918_v53  ;;  %2428 = vmatmul.msk.f32.gmra.mxu1 %vm235_vm0, %v1766_v44  ;;  %v1563_v53 = vmul.f32 %v3854_v31, %v3542_v34  ;;  %v1317_v44 = vmul.f32 %v3875_v14, %v3523_v51 }
 0x208   :  { %2472 = vmatmul.msk.f32.gmra.mxu3 %vm235_vm0, %v2017_v32 }
 0x20b   :  { %v1622_v50 = vpop.f32.mrf.mxu3 }
 0x20c   :  { %v1623_v26 = vadd.f32 %v1622_v50, %v1557_v43  ;;  %v920_v52 = vpop.f32.mrf.mxu1 }
 0x20d   :  { %v921_v21 = vadd.f32 %v920_v52, %v833_v48 }
 0x20e   :  { %2396 = vst.msk [vmem:[%s4194_s6 + $0x1e0] sm:$0xff] %vm432_vm1, %v1623_v26  ;;  %v1769_v20 = vpop.f32.mrf.mxu0 }
 0x20f   :  { %v2020_v12 = vpop.f32.mrf.mxu2  ;;  %2281 = vst.msk [vmem:[%s4194_s6 + $0x118] sm:$0x7f] %vm444_vm2, %v921_v21  ;;  %2429 = vmatmul.msk.f32.gmra.mxu1 %vm235_vm0, %v1769_v20  ;;  %v1564_v21 = vmul.f32 %v3854_v31, %v3561_v2  ;;  %v1318_v20 = vmul.f32 %v3875_v14, %v3542_v34 }
 0x210   :  { %2473 = vmatmul.msk.f32.gmra.mxu3 %vm235_vm0, %v2020_v12 }
 0x213   :  { %v1625_v19 = vpop.f32.mrf.mxu3 }
 0x214   :  { %v1626_v6 = vadd.f32 %v1625_v19, %v1558_v28  ;;  %v1377_v60 = vpop.f32.mrf.mxu1 }
 0x215   :  { %v1378_v42 = vadd.f32 %v1377_v60, %v1312_v22  ;;  %v1565_v60 = vmul.f32 %v3854_v31, %v3580_v41 }
 0x216   :  { %2397 = vst.msk [vmem:[%s4194_s6 + $0x1e8] sm:$0xff] %vm432_vm1, %v1626_v6  ;;  %v1772_v23 = vpop.f32.mrf.mxu0 }
 0x217   :  { %v2023_v55 = vpop.f32.mrf.mxu2  ;;  %2354 = vst.msk [vmem:[%s4194_s6 + $0x180] sm:$0xff] %vm432_vm1, %v1378_v42  ;;  %2430 = vmatmul.msk.f32.gmra.mxu1 %vm235_vm0, %v1772_v23  ;;  %v1319_v42 = vmul.f32 %v3875_v14, %v3561_v2 }
 0x218   :  { %2474 = vmatmul.msk.f32.gmra.mxu3 %vm235_vm0, %v2023_v55 }
 0x21b   :  { %v1628_v58 = vpop.f32.mrf.mxu3 }
 0x21c   :  { %v1629_v47 = vadd.f32 %v1628_v58, %v1559_v61  ;;  %v1380_v5 = vpop.f32.mrf.mxu1 }
 0x21d   :  { %v1381_v0 = vadd.f32 %v1380_v5, %v1313_v57  ;;  %v1320_v5 = vmul.f32 %v3875_v14, %v3580_v41 }
 0x21e   :  { %2398 = vst.msk [vmem:[%s4194_s6 + $0x1f0] sm:$0xff] %vm432_vm1, %v1629_v47  ;;  %v1775_v46 = vpop.f32.mrf.mxu0  ;;  %v1566_v47 = vmul.f32 %v3854_v31, %v3598_v39 }
 0x21f   :  { %v2026_v3 = vpop.f32.mrf.mxu2  ;;  %2355 = vst.msk [vmem:[%s4194_s6 + $0x188] sm:$0xff] %vm432_vm1, %v1381_v0  ;;  %2431 = vmatmul.msk.f32.gmra.mxu1 %vm235_vm0, %v1775_v46 }
 0x220   :  { %2475 = vmatmul.msk.f32.gmra.mxu3 %vm235_vm0, %v2026_v3 }
 0x223   :  { %v1631_v9 = vpop.f32.mrf.mxu3 }
 0x224   :  { %v1632_v1 = vadd.f32 %v1631_v9, %v1560_v40  ;;  %v1383_v13 = vpop.f32.mrf.mxu1  ;;  %v1321_v9 = vmul.f32 %v3875_v14, %v3598_v39 }
 0x225   :  { %v1384_v62 = vadd.f32 %v1383_v13, %v1314_v30  ;;  %v1567_v30 = vmul.f32 %v3854_v31, %v3617_v36 }
 0x226   :  { %2399 = vst.msk [vmem:[%s4194_s6 + $0x1f8] sm:$0xff] %vm432_vm1, %v1632_v1  ;;  %v1778_v56 = vpop.f32.mrf.mxu0 }
 0x227   :  { %v2029_v49 = vpop.f32.mrf.mxu2  ;;  %2356 = vst.msk [vmem:[%s4194_s6 + $0x190] sm:$0xff] %vm432_vm1, %v1384_v62  ;;  %2432 = vmatmul.msk.f32.gmra.mxu1 %vm235_vm0, %v1778_v56 }
 0x228   :  { %2476 = vmatmul.msk.f32.gmra.mxu3 %vm235_vm0, %v2029_v49  ;;  %v1568_v49 = vmul.f32 %v3854_v31, %v3640_v33  ;;  %v2534_v31 = vld [vmem:[#allocation11] sm:$0xff] }
 0x22b   :  { %v1634_v4 = vpop.f32.mrf.mxu3 }
 0x22c   :  { %v1635_v18 = vadd.f32 %v1634_v4, %v1561_v27  ;;  %v1386_v45 = vpop.f32.mrf.mxu1  ;;  %v1322_v27 = vmul.f32 %v3875_v14, %v3617_v36 }
 0x22d   :  { %v1387_v15 = vadd.f32 %v1386_v45, %v1315_v25  ;;  %v4028_v45 = vstv %s2045_s4 }
 0x22e   :  { %2400 = vst.msk [vmem:[%s4194_s6 + $0x200] sm:$0xff] %vm432_vm1, %v1635_v18  ;;  %v1781_v17 = vpop.f32.mrf.mxu0 }
 0x22f   :  { %v2032_v7 = vpop.f32.mrf.mxu2  ;;  %2357 = vst.msk [vmem:[%s4194_s6 + $0x198] sm:$0xff] %vm432_vm1, %v1387_v15  ;;  %2433 = vmatmul.msk.f32.gmra.mxu1 %vm235_vm0, %v1781_v17  ;;  %v2047_v17 = vmul.f32 %v2534_v31, %v4028_v45 }
 0x230   :  { %2477 = vmatmul.msk.f32.gmra.mxu3 %vm235_vm0, %v2032_v7  ;;  %v1323_v7 = vmul.f32 %v3875_v14, %v3640_v33  ;;  %v2048_v14 = vmul.f32 %v4028_v45, %v3439_v11  ;;  %v2535_v11 = vld [vmem:[#allocation11 + $0x8] sm:$0xff] }
 0x233   :  { %v1637_v24 = vpop.f32.mrf.mxu3 }
 0x234   :  { %v1638_v38 = vadd.f32 %v1637_v24, %v1562_v59  ;;  %v1389_v29 = vpop.f32.mrf.mxu1 }
 0x235   :  { %v1390_v8 = vadd.f32 %v1389_v29, %v1316_v10  ;;  %v4046_v29 = vstv %s1800_s19 }
 0x236   :  { %2401 = vst.msk [vmem:[%s4194_s6 + $0x208] sm:$0xff] %vm432_vm1, %v1638_v38  ;;  %v1784_v35 = vpop.f32.mrf.mxu0 }
 0x237   :  { %v2035_v37 = vpop.f32.mrf.mxu2  ;;  %2358 = vst.msk [vmem:[%s4194_s6 + $0x1a0] sm:$0xff] %vm432_vm1, %v1390_v8  ;;  %2434 = vmatmul.msk.f32.gmra.mxu1 %vm235_vm0, %v1784_v35  ;;  %v1802_v8 = vmul.f32 %v2534_v31, %v4046_v29 }
 0x238   :  { %2478 = vmatmul.msk.f32.gmra.mxu3 %vm235_vm0, %v2035_v37 }
 0x23b   :  { %v1640_v32 = vpop.f32.mrf.mxu3 }
 0x23c   :  { %v1641_v43 = vadd.f32 %v1640_v32, %v1563_v53  ;;  %v1392_v48 = vpop.f32.mrf.mxu1  ;;  %v2049_v32 = vmul.f32 %v4028_v45, %v3459_v54 }
 0x23d   :  { %v1393_v50 = vadd.f32 %v1392_v48, %v1317_v44 }
 0x23e   :  { %2402 = vst.msk [vmem:[%s4194_s6 + $0x210] sm:$0xff] %vm432_vm1, %v1641_v43  ;;  %v1787_v26 = vpop.f32.mrf.mxu0  ;;  %v1803_v43 = vmul.f32 %v2535_v11, %v4046_v29 }
 0x23f   :  { %v2038_v52 = vpop.f32.mrf.mxu2  ;;  %2359 = vst.msk [vmem:[%s4194_s6 + $0x1a8] sm:$0xff] %vm432_vm1, %v1393_v50  ;;  %2435 = vmatmul.msk.f32.gmra.mxu1 %vm235_vm0, %v1787_v26 }
 0x240   :  { %2479 = vmatmul.msk.f32.gmra.mxu3 %vm235_vm0, %v2038_v52 }
 0x243   :  { %v1643_v12 = vpop.f32.mrf.mxu3 }
 0x244   :  { %v1644_v28 = vadd.f32 %v1643_v12, %v1564_v21  ;;  %v1395_v22 = vpop.f32.mrf.mxu1  ;;  %v2050_v21 = vmul.f32 %v4028_v45, %v3481_v16 }
 0x245   :  { %v1396_v19 = vadd.f32 %v1395_v22, %v1318_v20  ;;  %v1804_v20 = vmul.f32 %v4046_v29, %v3459_v54  ;;  %v1805_v54 = vmul.f32 %v4046_v29, %v3481_v16  ;;  %v1806_v16 = vmul.f32 %v4046_v29, %v3503_v63 }
 0x246   :  { %2403 = vst.msk [vmem:[%s4194_s6 + $0x218] sm:$0xff] %vm432_vm1, %v1644_v28  ;;  %v1790_v6 = vpop.f32.mrf.mxu0 }
 0x247   :  { %2360 = vst.msk [vmem:[%s4194_s6 + $0x1b0] sm:$0xff] %vm432_vm1, %v1396_v19  ;;  %2436 = vmatmul.msk.f32.gmra.mxu1 %vm235_vm0, %v1790_v6  ;;  %v2051_v6 = vmul.f32 %v4028_v45, %v3503_v63  ;;  %v1807_v63 = vmul.f32 %v4046_v29, %v3523_v51 }
 0x24b   :  { %v1646_v23 = vpop.f32.mrf.mxu3 }
 0x24c   :  { %v1647_v55 = vadd.f32 %v1646_v23, %v1565_v60  ;;  %v1398_v61 = vpop.f32.mrf.mxu1 }
 0x24d   :  { %v1399_v57 = vadd.f32 %v1398_v61, %v1319_v42  ;;  %v2052_v61 = vmul.f32 %v4028_v45, %v3523_v51  ;;  %v1808_v51 = vmul.f32 %v4046_v29, %v3542_v34 }
 0x24e   :  { %2404 = vst.msk [vmem:[%s4194_s6 + $0x220] sm:$0xff] %vm432_vm1, %v1647_v55  ;;  %v1793_v58 = vpop.f32.mrf.mxu0 }
 0x24f   :  { %2361 = vst.msk [vmem:[%s4194_s6 + $0x1b8] sm:$0xff] %vm432_vm1, %v1399_v57  ;;  %2437 = vmatmul.msk.f32.gmra.mxu1 %vm235_vm0, %v1793_v58 }
 0x253   :  { %v1649_v0 = vpop.f32.mrf.mxu3 }
 0x254   :  { %v1650_v46 = vadd.f32 %v1649_v0, %v1566_v47  ;;  %v1401_v3 = vpop.f32.mrf.mxu1  ;;  %v2053_v0 = vmul.f32 %v4028_v45, %v3542_v34  ;;  %v1809_v34 = vmul.f32 %v4046_v29, %v3561_v2 }
 0x255   :  { %v1402_v40 = vadd.f32 %v1401_v3, %v1320_v5 }
 0x256   :  { %2405 = vst.msk [vmem:[%s4194_s6 + $0x228] sm:$0xff] %vm432_vm1, %v1650_v46 }
 0x257   :  { %2362 = vst.msk [vmem:[%s4194_s6 + $0x1c0] sm:$0xff] %vm432_vm1, %v1402_v40 }
 0x25b   :  { %v1652_v1 = vpop.f32.mrf.mxu3 }
 0x25c   :  { %v1653_v13 = vadd.f32 %v1652_v1, %v1567_v30  ;;  %v1404_v62 = vpop.f32.mrf.mxu1 }
 0x25d   :  { %v1405_v56 = vadd.f32 %v1404_v62, %v1321_v9  ;;  %v2054_v9 = vmul.f32 %v4028_v45, %v3561_v2  ;;  %v1810_v2 = vmul.f32 %v4046_v29, %v3580_v41 }
 0x25e   :  { %2406 = vst.msk [vmem:[%s4194_s6 + $0x230] sm:$0xff] %vm432_vm1, %v1653_v13 }
 0x25f   :  { %2363 = vst.msk [vmem:[%s4194_s6 + $0x1c8] sm:$0xff] %vm432_vm1, %v1405_v56 }
 0x263   :  { %v1655_v25 = vpop.f32.mrf.mxu3 }
 0x264   :  { %v1656_v4 = vadd.f32 %v1655_v25, %v1568_v49  ;;  %v1407_v18 = vpop.f32.mrf.mxu1  ;;  %v2055_v49 = vmul.f32 %v4028_v45, %v3580_v41  ;;  %v1811_v41 = vmul.f32 %v4046_v29, %v3598_v39 }
 0x265   :  { %v1408_v15 = vadd.f32 %v1407_v18, %v1322_v27 }
 0x266   :  { %2407 = vst.msk [vmem:[%s4194_s6 + $0x238] sm:$0x7f] %vm444_vm2, %v1656_v4 }
 0x267   :  { %2364 = vst.msk [vmem:[%s4194_s6 + $0x1d0] sm:$0xff] %vm432_vm1, %v1408_v15  ;;  %v2056_v15 = vmul.f32 %v4028_v45, %v3598_v39  ;;  %v1812_v39 = vmul.f32 %v4046_v29, %v3617_v36 }
 0x26b   :  { %v2112_v59 = vpop.f32.mrf.mxu3 }
 0x26c   :  { %v2113_v10 = vadd.f32 %v2112_v59, %v2047_v17  ;;  %v1410_v24 = vpop.f32.mrf.mxu1 }
 0x26d   :  { %v1411_v38 = vadd.f32 %v1410_v24, %v1323_v7 }
 0x26e   :  { %2480 = vst.msk [vmem:[%s4194_s6 + $0x2a0] sm:$0xff] %vm432_vm1, %v2113_v10  ;;  %v2057_v10 = vmul.f32 %v4028_v45, %v3617_v36 }
 0x26f   :  { %2365 = vst.msk [vmem:[%s4194_s6 + $0x1d8] sm:$0x7f] %vm444_vm2, %v1411_v38 }
 0x273   :  { %v2115_v35 = vpop.f32.mrf.mxu3 }
 0x274   :  { %v2116_v37 = vadd.f32 %v2115_v35, %v2048_v14  ;;  %v1867_v53 = vpop.f32.mrf.mxu1  ;;  %v2058_v35 = vmul.f32 %v4028_v45, %v3640_v33  ;;  %v1813_v45 = vmul.f32 %v4046_v29, %v3640_v33 }
 0x275   :  { %v1868_v44 = vadd.f32 %v1867_v53, %v1802_v8 }
 0x276   :  { %2481 = vst.msk [vmem:[%s4194_s6 + $0x2a8] sm:$0xff] %vm432_vm1, %v2116_v37 }
 0x277   :  { %2438 = vst.msk [vmem:[%s4194_s6 + $0x240] sm:$0xff] %vm432_vm1, %v1868_v44 }
 0x27b   :  { %v2118_v48 = vpop.f32.mrf.mxu3 }
 0x27c   :  { %v2119_v50 = vadd.f32 %v2118_v48, %v2049_v32  ;;  %v1870_v26 = vpop.f32.mrf.mxu1 }
 0x27d   :  { %v1871_v52 = vadd.f32 %v1870_v26, %v1803_v43 }
 0x27e   :  { %2482 = vst.msk [vmem:[%s4194_s6 + $0x2b0] sm:$0xff] %vm432_vm1, %v2119_v50 }
 0x27f   :  { %2439 = vst.msk [vmem:[%s4194_s6 + $0x248] sm:$0xff] %vm432_vm1, %v1871_v52 }
 0x283   :  { %v2121_v12 = vpop.f32.mrf.mxu3 }
 0x284   :  { %v2122_v28 = vadd.f32 %v2121_v12, %v2050_v21  ;;  %v1873_v22 = vpop.f32.mrf.mxu1 }
 0x285   :  { %v1874_v19 = vadd.f32 %v1873_v22, %v1804_v20 }
 0x286   :  { %2483 = vst.msk [vmem:[%s4194_s6 + $0x2b8] sm:$0xff] %vm432_vm1, %v2122_v28 }
 0x287   :  { %2440 = vst.msk [vmem:[%s4194_s6 + $0x250] sm:$0xff] %vm432_vm1, %v1874_v19 }
 0x28b   :  { %v2124_v60 = vpop.f32.mrf.mxu3 }
 0x28c   :  { %v2125_v42 = vadd.f32 %v2124_v60, %v2051_v6  ;;  %v1876_v23 = vpop.f32.mrf.mxu1 }
 0x28d   :  { %v1877_v55 = vadd.f32 %v1876_v23, %v1805_v54 }
 0x28e   :  { %2484 = vst.msk [vmem:[%s4194_s6 + $0x2c0] sm:$0xff] %vm432_vm1, %v2125_v42 }
 0x28f   :  { %2441 = vst.msk [vmem:[%s4194_s6 + $0x258] sm:$0xff] %vm432_vm1, %v1877_v55 }
 0x293   :  { %v2127_v57 = vpop.f32.mrf.mxu3 }
 0x294   :  { %v2128_v58 = vadd.f32 %v2127_v57, %v2052_v61  ;;  %v1879_v47 = vpop.f32.mrf.mxu1 }
 0x295   :  { %v1880_v5 = vadd.f32 %v1879_v47, %v1806_v16 }
 0x296   :  { %2485 = vst.msk [vmem:[%s4194_s6 + $0x2c8] sm:$0xff] %vm432_vm1, %v2128_v58 }
 0x297   :  { %2442 = vst.msk [vmem:[%s4194_s6 + $0x260] sm:$0xff] %vm432_vm1, %v1880_v5 }
 0x29b   :  { %v2130_v46 = vpop.f32.mrf.mxu3 }
 0x29c   :  { %v2131_v3 = vadd.f32 %v2130_v46, %v2053_v0  ;;  %v1882_v40 = vpop.f32.mrf.mxu1 }
 0x29d   :  { %v1883_v30 = vadd.f32 %v1882_v40, %v1807_v63 }
 0x29e   :  { %2486 = vst.msk [vmem:[%s4194_s6 + $0x2d0] sm:$0xff] %vm432_vm1, %v2131_v3 }
 0x29f   :  { %2443 = vst.msk [vmem:[%s4194_s6 + $0x268] sm:$0xff] %vm432_vm1, %v1883_v30 }
 0x2a3   :  { %v2133_v1 = vpop.f32.mrf.mxu3 }
 0x2a4   :  { %v2134_v13 = vadd.f32 %v2133_v1, %v2054_v9  ;;  %v1885_v62 = vpop.f32.mrf.mxu1 }
 0x2a5   :  { %v1886_v56 = vadd.f32 %v1885_v62, %v1808_v51 }
 0x2a6   :  { %2487 = vst.msk [vmem:[%s4194_s6 + $0x2d8] sm:$0xff] %vm432_vm1, %v2134_v13 }
 0x2a7   :  { %2444 = vst.msk [vmem:[%s4194_s6 + $0x270] sm:$0xff] %vm432_vm1, %v1886_v56 }
 0x2ab   :  { %v2136_v27 = vpop.f32.mrf.mxu3 }
 0x2ac   :  { %v2137_v25 = vadd.f32 %v2136_v27, %v2055_v49  ;;  %v1888_v4 = vpop.f32.mrf.mxu1 }
 0x2ad   :  { %v1889_v18 = vadd.f32 %v1888_v4, %v1809_v34 }
 0x2ae   :  { %2488 = vst.msk [vmem:[%s4194_s6 + $0x2e0] sm:$0xff] %vm432_vm1, %v2137_v25 }
 0x2af   :  { %2445 = vst.msk [vmem:[%s4194_s6 + $0x278] sm:$0xff] %vm432_vm1, %v1889_v18 }
 0x2b3   :  { %v2139_v31 = vpop.f32.mrf.mxu3 }
 0x2b4   :  { %v2140_v17 = vadd.f32 %v2139_v31, %v2056_v15  ;;  %v1891_v7 = vpop.f32.mrf.mxu1 }
 0x2b5   :  { %v1892_v59 = vadd.f32 %v1891_v7, %v1810_v2 }
 0x2b6   :  { %2489 = vst.msk [vmem:[%s4194_s6 + $0x2e8] sm:$0xff] %vm432_vm1, %v2140_v17 }
 0x2b7   :  { %2446 = vst.msk [vmem:[%s4194_s6 + $0x280] sm:$0xff] %vm432_vm1, %v1892_v59 }
 0x2bb   :  { %v2142_v24 = vpop.f32.mrf.mxu3 }
 0x2bc   :  { %v2143_v38 = vadd.f32 %v2142_v24, %v2057_v10  ;;  %v1894_v14 = vpop.f32.mrf.mxu1 }
 0x2bd   :  { %v1895_v8 = vadd.f32 %v1894_v14, %v1811_v41 }
 0x2be   :  { %2490 = vst.msk [vmem:[%s4194_s6 + $0x2f0] sm:$0xff] %vm432_vm1, %v2143_v38 }
 0x2bf   :  { %2447 = vst.msk [vmem:[%s4194_s6 + $0x288] sm:$0xff] %vm432_vm1, %v1895_v8 }
 0x2c3   :  { %v2145_v37 = vpop.f32.mrf.mxu3 }
 0x2c4   :  { %v2146_v53 = vadd.f32 %v2145_v37, %v2058_v35  ;;  %v1897_v44 = vpop.f32.mrf.mxu1 }
 0x2c5   :  { %v1898_v32 = vadd.f32 %v1897_v44, %v1812_v39 }
 0x2c6   :  { %2491 = vst.msk [vmem:[%s4194_s6 + $0x2f8] sm:$0x7f] %vm444_vm2, %v2146_v53 }
 0x2c7   :  { %2448 = vst.msk [vmem:[%s4194_s6 + $0x290] sm:$0xff] %vm432_vm1, %v1898_v32 }
 0x2cc   :  { %v1900_v11 = vpop.f32.mrf.mxu1 }
 0x2cd   :  { %v1901_v43 = vadd.f32 %v1900_v11, %v1813_v45 }
 0x2cf   :  { %2449 = vst.msk [vmem:[%s4194_s6 + $0x298] sm:$0x7f] %vm444_vm2, %v1901_v43 }
 0x2d0   :  { %2165 = vsyncpa [#allocation3], 1 }
 0x2d1   :  { %2166 = vsyncpa [#allocation9], 1 }
 0x2d2   :  { %2167 = vsyncpa [#allocation12], 1 }
 0x2d3   :  { %2168 = vsyncpa [#allocation4], 1 }
 0x2d4   :  { %2169 = vsyncpa [#allocation7], 1 }

</bundles_post_ra>
